<compile_context>
chip_gen: v7x
topology: tpu7x:2x2x1
jax: 0.10.0
libtpu: 0.0.40
codegen_flags: <defaults>
</compile_context>

<pallas_src>
import functools

import jax
import jax.numpy as jnp
from jax import lax
from jax.experimental import pallas as pl
from jax.experimental.pallas import tpu as pltpu


# ---------------------------------------------------------------------------
# Kernel A: fused qkv 1x1 conv + 3x3 depthwise conv (channels-last, H-row tiles)
# ---------------------------------------------------------------------------
def _qkv_dw_kernel(x_ref, wq_ref, bq_ref, wd_ref, bd_ref, o_ref, pad_ref):
    # x_ref : (1, tile_h+2, W, C)   input rows incl. +/-1 halo (channels-last)
    # wq_ref: (C, 3C), bq_ref: (1, 3C)          1x1 qkv conv weight / bias
    # wd_ref: (9, 1, 3C), bd_ref: (1, 3C)       depthwise taps (dy*3+dx major) / bias
    # o_ref : (1, tile_h, W, 3C)
    # pad_ref: VMEM scratch (tile_h+2, W+2, 3C) f32 -- W-zero-padded qkv tile
    th2, W, C = x_ref.shape[1], x_ref.shape[2], x_ref.shape[3]
    tile_h, C3 = o_ref.shape[1], o_ref.shape[3]

    # ---- fused 1x1 conv: (rows, C) @ (C, 3C) on the MXU, f32 accumulation ----
    # Merging (tile_h+2, W) -> rows keeps the lane dim (C) untouched.
    x2 = x_ref[0].reshape(th2 * W, C)
    qkv = jnp.dot(x2, wq_ref[...], preferred_element_type=jnp.float32)
    qkv = qkv.reshape(th2, W, C3) + bq_ref[...].astype(jnp.float32)

    # ---- stage into a W-zero-padded VMEM scratch ----
    pad_ref[...] = jnp.zeros_like(pad_ref)
    pad_ref[:, 1:W + 1, :] = qkv

    # Halo rows outside the image must be ZERO in qkv space (the depthwise conv's
    # zero padding applies *after* the pointwise conv + bias).
    @pl.when(pl.program_id(1) == 0)
    def _zero_top():
        pad_ref[0] = jnp.zeros((W + 2, C3), jnp.float32)

    @pl.when(pl.program_id(1) == pl.num_programs(1) - 1)
    def _zero_bottom():
        pad_ref[th2 - 1] = jnp.zeros((W + 2, C3), jnp.float32)

    # ---- 3x3 depthwise conv: 9-tap FMA over the padded tile ----
    acc = jnp.zeros((tile_h, W, C3), jnp.float32)
    for dy in range(3):
        for dx in range(3):
            win = pad_ref[dy:dy + tile_h, dx:dx + W, :]
            acc = acc + win * wd_ref[dy * 3 + dx].astype(jnp.float32)
    acc = acc + bd_ref[...].astype(jnp.float32)
    o_ref[0] = acc.astype(o_ref.dtype)


def _fused_qkv_dwconv(x_halo, w_qkv, b_qkv, w_dw9, b_dw, n_tiles, out_dtype):
    BT, th2, W, C = x_halo.shape
    B = BT // n_tiles
    tile_h = th2 - 2
    C3 = w_qkv.shape[1]

    def tile_map(b, i):
        return (b * n_tiles + i, 0, 0, 0)

    return pl.pallas_call(
        _qkv_dw_kernel,
        out_shape=jax.ShapeDtypeStruct((BT, tile_h, W, C3), out_dtype),
        grid_spec=pltpu.PrefetchScalarGridSpec(
            num_scalar_prefetch=0,
            grid=(B, n_tiles),
            in_specs=[
                pl.BlockSpec((1, th2, W, C), tile_map),
                pl.BlockSpec((C, C3), lambda b, i: (0, 0)),
                pl.BlockSpec((1, C3), lambda b, i: (0, 0)),
                pl.BlockSpec((9, 1, C3), lambda b, i: (0, 0, 0)),
                pl.BlockSpec((1, C3), lambda b, i: (0, 0)),
            ],
            out_specs=pl.BlockSpec((1, tile_h, W, C3), tile_map),
            scratch_shapes=[pltpu.VMEM((th2, W + 2, C3), jnp.float32)],
        ),
        compiler_params=pltpu.CompilerParams(
            dimension_semantics=("parallel", "parallel")),
    )(x_halo, w_qkv, b_qkv, w_dw9, b_dw)


# ---------------------------------------------------------------------------
# Kernel B: fused channel attention (all heads per step) + project_out
# ---------------------------------------------------------------------------
def _attn_proj_kernel(temp_ref, qkv_ref, wp_ref, bp_ref, o_ref, *, num_heads):
    # temp_ref: SMEM (heads,)
    # qkv_ref : (1, HW, 3C) channels-last [q | k | v], head-major within each third
    # wp_ref  : (C, C)  project_out weight (out, in);  bp_ref: (C, 1)
    # o_ref   : (1, C, HW) channels-first output (lane dim = HW, lane-dense)
    blk = qkv_ref[0].astype(jnp.float32)                    # (HW, 3C)
    C = wp_ref.shape[0]
    ch = C // num_heads

    head_outs = []
    for h in range(num_heads):
        q = blk[:, h * ch:(h + 1) * ch]                     # (HW, ch)
        k = blk[:, C + h * ch:C + (h + 1) * ch]
        v = blk[:, 2 * C + h * ch:2 * C + (h + 1) * ch]

        # F.normalize(dim=-1) in the PyTorch (c, HW) layout == per-column L2 norm over
        # HW here; 1/max(||x||, 1e-12) == rsqrt(max(||x||^2, 1e-24)).
        qn = q * lax.rsqrt(jnp.maximum(jnp.sum(q * q, axis=0, keepdims=True), 1e-24))
        kn = k * lax.rsqrt(jnp.maximum(jnp.sum(k * k, axis=0, keepdims=True), 1e-24))

        # attn[i, j] = sum_n qn[n, i] kn[n, j]   (== q @ k^T in PyTorch layout)
        attn = lax.dot_general(qn, kn, (((0,), (0,)), ((), ())),
                               preferred_element_type=jnp.float32)   # (ch, ch)
        attn = attn * temp_ref[h]
        attn = attn - jnp.max(attn, axis=-1, keepdims=True)
        e = jnp.exp(attn)
        p = e * pl.reciprocal(jnp.sum(e, axis=-1, keepdims=True), approx=True)

        # out[i, n] = sum_j p[i, j] v[n, j]   -> channels-first (ch, HW)
        head_outs.append(lax.dot_general(p, v, (((1,), (1,)), ((), ())),
                                         preferred_element_type=jnp.float32))

    attn_cf = jnp.concatenate(head_outs, axis=0)            # (C, HW)

    # fused project_out (1x1 conv): (C, C) @ (C, HW) + bias
    proj = jnp.dot(wp_ref[...].astype(jnp.float32), attn_cf,
                   preferred_element_type=jnp.float32)
    proj = proj + bp_ref[...].astype(jnp.float32)
    o_ref[0] = proj.astype(o_ref.dtype)


def _channel_attention_project(qkv_flat, temp, w_proj, b_proj, num_heads, out_dtype):
    B, HW, C3 = qkv_flat.shape
    C = C3 // 3
    kernel = functools.partial(_attn_proj_kernel, num_heads=num_heads)
    return pl.pallas_call(
        kernel,
        out_shape=jax.ShapeDtypeStruct((B, C, HW), out_dtype),
        grid_spec=pltpu.PrefetchScalarGridSpec(
            num_scalar_prefetch=1,                          # temperature -> SMEM
            grid=(B,),
            in_specs=[
                pl.BlockSpec((1, HW, C3), lambda b, t: (b, 0, 0)),
                pl.BlockSpec((C, C), lambda b, t: (0, 0)),
                pl.BlockSpec((C, 1), lambda b, t: (0, 0)),
            ],
            out_specs=pl.BlockSpec((1, C, HW), lambda b, t: (b, 0, 0)),
        ),
        compiler_params=pltpu.CompilerParams(dimension_semantics=("parallel",)),
    )(temp, qkv_flat, w_proj, b_proj)


# ---------------------------------------------------------------------------
# Full forward pass (matches ChannelAttention.forward)
# ---------------------------------------------------------------------------
def _choose_tile_h(H, W, C3, itemsize=4):
    # Largest divisor of H such that the per-step output tile stays ~2 MiB (safe when
    # double-buffered on every chip generation), capped so there are multiple grid steps
    # for DMA pipelining and megacore / 2-TC sharding.
    budget = 2 << 20
    cap = max(1, budget // max(1, W * C3 * itemsize))
    cap = min(cap, 64, H)
    if H >= 16:
        cap = min(cap, max(8, H // 2))
    for d in range(cap, 0, -1):
        if H % d == 0:
            return d
    return 1


def channel_attention_forward(x, params, num_heads, qkv_store_dtype=None):
    """x: (B, C, H, W) NCHW; params hold PyTorch-layout conv weights / temperature.

    qkv_store_dtype: dtype of the single HBM intermediate (qkv after the dwconv).
    Pass jnp.bfloat16 to halve HBM traffic of the dominant tensor on v6e/v7x
    (all in-kernel compute / accumulation stays f32).
    """
    B, C, H, W = x.shape
    C3, HW = 3 * C, H * W
    store_dtype = x.dtype if qkv_store_dtype is None else qkv_store_dtype

    # channels-last row tiles of x with +/-1 halo row (zero rows at the image borders)
    tile_h = _choose_tile_h(H, W, C3)
    n_tiles = H // tile_h
    x_nhwc = jnp.transpose(x, (0, 2, 3, 1))
    x_pad = jnp.pad(x_nhwc, ((0, 0), (1, 1), (0, 0), (0, 0)))
    x_halo = jnp.stack(
        [x_pad[:, i * tile_h:i * tile_h + tile_h + 2] for i in range(n_tiles)],
        axis=1).reshape(B * n_tiles, tile_h + 2, W, C)

    w_qkv = params["qkv_w"].reshape(C3, C).T                    # (C, 3C)
    b_qkv = params["qkv_b"].reshape(1, C3)
    w_dw9 = params["dw_w"].reshape(C3, 9).T.reshape(9, 1, C3)   # tap-major, channels-last
    b_dw = params["dw_b"].reshape(1, C3)

    # Kernel A: fused qkv 1x1 conv + 3x3 depthwise conv (only HBM intermediate)
    qkv_dw = _fused_qkv_dwconv(x_halo, w_qkv, b_qkv, w_dw9, b_dw, n_tiles, store_dtype)
    qkv_flat = qkv_dw.reshape(B, HW, C3)                        # contiguous reshape

    # Kernel B: fused channel attention (all heads per step) + project_out.
    # TODO(synk): for very large H*W, tile this kernel over HW with a two-pass L2-norm
    # accumulation; a single (HW, 3C) block per batch is used here.
    temp = params["temperature"].reshape(num_heads)
    w_proj = params["proj_w"].reshape(C, C)                     # (out, in)
    b_proj = params["proj_b"].reshape(C, 1)
    out_cf = _channel_attention_project(qkv_flat, temp, w_proj, b_proj,
                                        num_heads, x.dtype)     # (B, C, HW)
    return out_cf.reshape(B, C, H, W)


# ---------------------------------------------------------------------------
# Pure-JAX reference (mirrors the PyTorch module exactly)
# ---------------------------------------------------------------------------
def _reference(x, p, num_heads):
    B, C, H, W = x.shape
    hp = jax.lax.Precision.HIGHEST
    qkv = jax.lax.conv_general_dilated(
        x, p["qkv_w"], window_strides=(1, 1), padding="VALID",
        dimension_numbers=("NCHW", "OIHW", "NCHW"), precision=hp)
    qkv = qkv + p["qkv_b"].reshape(1, -1, 1, 1)
    qkv = jax.lax.conv_general_dilated(
        qkv, p["dw_w"], window_strides=(1, 1), padding=((1, 1), (1, 1)),
        dimension_numbers=("NCHW", "OIHW", "NCHW"),
        feature_group_count=3 * C, precision=hp)
    qkv = qkv + p["dw_b"].reshape(1, -1, 1, 1)
    q, k, v = jnp.split(qkv, 3, axis=1)

    def to_heads(t):
        return t.reshape(B, num_heads, C // num_heads, H * W)

    q, k, v = to_heads(q), to_heads(k), to_heads(v)
    q = q / jnp.maximum(jnp.sqrt(jnp.sum(q * q, axis=-1, keepdims=True)), 1e-12)
    k = k / jnp.maximum(jnp.sqrt(jnp.sum(k * k, axis=-1, keepdims=True)), 1e-12)
    attn = jnp.einsum("bhcn,bhdn->bhcd", q, k, precision=hp)
    attn = attn * p["temperature"][None]
    attn = jax.nn.softmax(attn, axis=-1)
    out = jnp.einsum("bhcd,bhdn->bhcn", attn, v, precision=hp)
    out = out.reshape(B, C, H, W)
    out = jax.lax.conv_general_dilated(
        out, p["proj_w"], window_strides=(1, 1), padding="VALID",
        dimension_numbers=("NCHW", "OIHW", "NCHW"), precision=hp)
    return out + p["proj_b"].reshape(1, -1, 1, 1)


if __name__ == "__main__":
    key = jax.random.PRNGKey(0)
    ks = jax.random.split(key, 8)

    B, C, H, W = 2, 32, 16, 16
    num_heads = 2
    C3 = 3 * C

    x = jax.random.normal(ks[0], (B, C, H, W), jnp.float32)
    params = {
        "qkv_w": jax.random.normal(ks[1], (C3, C, 1, 1), jnp.float32) / (C ** 0.5),
        "qkv_b": 0.1 * jax.random.normal(ks[2], (C3,), jnp.float32),
        "dw_w": jax.random.normal(ks[3], (C3, 1, 3, 3), jnp.float32) / 3.0,
        "dw_b": 0.1 * jax.random.normal(ks[4], (C3,), jnp.float32),
        "proj_w": jax.random.normal(ks[5], (C, C, 1, 1), jnp.float32) / (C ** 0.5),
        "proj_b": 0.1 * jax.random.normal(ks[6], (C,), jnp.float32),
        "temperature": jnp.ones((num_heads, 1, 1), jnp.float32)
        + 0.1 * jax.random.normal(ks[7], (num_heads, 1, 1), jnp.float32),
    }

    out = channel_attention_forward(x, params, num_heads)
    out = jax.block_until_ready(out)

    ref = _reference(x, params, num_heads)
    assert out.shape == (B, C, H, W) and out.dtype == x.dtype
    err = float(jnp.max(jnp.abs(out - ref)))
    scale = float(jnp.max(jnp.abs(ref))) + 1e-6
    assert err <= 3e-2 * scale, f"mismatch vs reference: max|diff|={err}, scale={scale}"
    print("KERNEL_OK")
</pallas_src>

<mosaic_0001>
module attributes {stable_mosaic.version = 11 : i64} {
  func.func @_qkv_dw_kernel(%arg0: i32, %arg1: i32, %arg2: memref<1x10x16x32xf32, #tpu.memory_space<vmem>>, %arg3: memref<32x96xf32, #tpu.memory_space<vmem>>, %arg4: memref<1x96xf32, #tpu.memory_space<vmem>>, %arg5: memref<9x1x96xf32, #tpu.memory_space<vmem>>, %arg6: memref<1x96xf32, #tpu.memory_space<vmem>>, %arg7: memref<1x8x16x96xf32, #tpu.memory_space<vmem>>, %arg8: memref<10x18x96xf32, #tpu.memory_space<vmem>>) attributes {dimension_semantics = [#tpu.dimension_semantics<parallel>, #tpu.dimension_semantics<parallel>], iteration_bounds = array<i64: 2, 2>, scalar_prefetch = 0 : i64, scratch_operands = 1 : i64, tpu.core_type = #tpu.core_type<tc>, window_params = [{transform_indices = @transform_0, window_bounds = array<i64: 1, 10, 16, 32>}, {pipeline_mode = #tpu.pipeline_mode<synchronous>, transform_indices = @transform_1, window_bounds = array<i64: 32, 96>}, {pipeline_mode = #tpu.pipeline_mode<synchronous>, transform_indices = @transform_2, window_bounds = array<i64: 1, 96>}, {pipeline_mode = #tpu.pipeline_mode<synchronous>, transform_indices = @transform_3, window_bounds = array<i64: 9, 1, 96>}, {pipeline_mode = #tpu.pipeline_mode<synchronous>, transform_indices = @transform_4, window_bounds = array<i64: 1, 96>}, {transform_indices = @transform_5, window_bounds = array<i64: 1, 8, 16, 96>}]} {
    %c0 = arith.constant 0 : index
    %c0_0 = arith.constant 0 : index
    %c0_1 = arith.constant 0 : index
    %c0_2 = arith.constant 0 : index
    %0 = vector.load %arg2[%c0, %c0_0, %c0_1, %c0_2] : memref<1x10x16x32xf32, #tpu.memory_space<vmem>>, vector<1x10x16x32xf32>
    %1 = vector.shape_cast %0 : vector<1x10x16x32xf32> to vector<10x16x32xf32>
    %2 = vector.shape_cast %1 : vector<10x16x32xf32> to vector<160x32xf32>
    %c0_3 = arith.constant 0 : index
    %c0_4 = arith.constant 0 : index
    %3 = vector.load %arg3[%c0_3, %c0_4] : memref<32x96xf32, #tpu.memory_space<vmem>>, vector<32x96xf32>
    %cst = arith.constant dense<0.000000e+00> : vector<160x96xf32>
    %4 = tpu.matmul %2, %3, %cst {dimension_numbers = #tpu.dot_dimension_numbers<[1], [0], [0], [1], [0, 0, 1, 1], [], []>} : vector<160x32xf32>, vector<32x96xf32>, vector<160x96xf32> -> vector<160x96xf32>
    %5 = vector.shape_cast %4 : vector<160x96xf32> to vector<10x16x96xf32>
    %c0_5 = arith.constant 0 : index
    %c0_6 = arith.constant 0 : index
    %6 = vector.load %arg4[%c0_5, %c0_6] : memref<1x96xf32, #tpu.memory_space<vmem>>, vector<1x96xf32>
    %7 = vector.shape_cast %6 : vector<1x96xf32> to vector<1x1x96xf32>
    %8 = vector.broadcast %7 : vector<1x1x96xf32> to vector<10x16x96xf32>
    %9 = arith.addf %5, %8 : vector<10x16x96xf32>
    %cst_7 = arith.constant 0.000000e+00 : f32
    %10 = vector.broadcast %cst_7 : f32 to vector<10x18x96xf32>
    %c0_8 = arith.constant 0 : index
    %c0_9 = arith.constant 0 : index
    %c0_10 = arith.constant 0 : index
    %11 = vector.load %arg8[%c0_8, %c0_9, %c0_10] : memref<10x18x96xf32, #tpu.memory_space<vmem>>, vector<10x18x96xf32>
    tpu.vector_store %arg8[%c0_8, %c0_9, %c0_10], %10 {strides = array<i32>} : memref<10x18x96xf32, #tpu.memory_space<vmem>>, vector<10x18x96xf32>,
    %c0_11 = arith.constant 0 : index
    %c1 = arith.constant 1 : index
    %c0_12 = arith.constant 0 : index
    %12 = vector.load %arg8[%c0_11, %c1, %c0_12] : memref<10x18x96xf32, #tpu.memory_space<vmem>>, vector<10x16x96xf32>
    tpu.vector_store %arg8[%c0_11, %c1, %c0_12], %9 {strides = array<i32>} : memref<10x18x96xf32, #tpu.memory_space<vmem>>, vector<10x16x96xf32>,
    %c0_i32 = arith.constant 0 : i32
    %13 = arith.cmpi eq, %arg1, %c0_i32 : i32
    %14 = arith.extui %13 : i1 to i32
    %c0_i32_13 = arith.constant 0 : i32
    %15 = arith.cmpi ne, %14, %c0_i32_13 : i32
    scf.if %15 {
      %cst_69 = arith.constant 0.000000e+00 : f32
      %90 = vector.broadcast %cst_69 : f32 to vector<18x96xf32>
      %c0_70 = arith.constant 0 : index
      %c0_71 = arith.constant 0 : index
      %c0_72 = arith.constant 0 : index
      %91 = vector.load %arg8[%c0_70, %c0_71, %c0_72] : memref<10x18x96xf32, #tpu.memory_space<vmem>>, vector<1x18x96xf32>
      %92 = vector.shape_cast %91 : vector<1x18x96xf32> to vector<18x96xf32>
      %93 = vector.shape_cast %90 : vector<18x96xf32> to vector<1x18x96xf32>
      tpu.vector_store %arg8[%c0_70, %c0_71, %c0_72], %93 {strides = array<i32>} : memref<10x18x96xf32, #tpu.memory_space<vmem>>, vector<1x18x96xf32>,
    } else {
    }
    %c1_i32 = arith.constant 1 : i32
    %16 = arith.cmpi eq, %arg1, %c1_i32 : i32
    %17 = arith.extui %16 : i1 to i32
    %c0_i32_14 = arith.constant 0 : i32
    %18 = arith.cmpi ne, %17, %c0_i32_14 : i32
    scf.if %18 {
      %cst_69 = arith.constant 0.000000e+00 : f32
      %90 = vector.broadcast %cst_69 : f32 to vector<18x96xf32>
      %c9 = arith.constant 9 : index
      %c0_70 = arith.constant 0 : index
      %c0_71 = arith.constant 0 : index
      %91 = vector.load %arg8[%c9, %c0_70, %c0_71] : memref<10x18x96xf32, #tpu.memory_space<vmem>>, vector<1x18x96xf32>
      %92 = vector.shape_cast %91 : vector<1x18x96xf32> to vector<18x96xf32>
      %93 = vector.shape_cast %90 : vector<18x96xf32> to vector<1x18x96xf32>
      tpu.vector_store %arg8[%c9, %c0_70, %c0_71], %93 {strides = array<i32>} : memref<10x18x96xf32, #tpu.memory_space<vmem>>, vector<1x18x96xf32>,
    } else {
    }
    %cst_15 = arith.constant 0.000000e+00 : f32
    %19 = vector.broadcast %cst_15 : f32 to vector<8x16x96xf32>
    %c0_16 = arith.constant 0 : index
    %c0_17 = arith.constant 0 : index
    %c0_18 = arith.constant 0 : index
    %20 = vector.load %arg8[%c0_16, %c0_17, %c0_18] : memref<10x18x96xf32, #tpu.memory_space<vmem>>, vector<8x16x96xf32>
    %c0_19 = arith.constant 0 : index
    %c0_20 = arith.constant 0 : index
    %c0_21 = arith.constant 0 : index
    %21 = vector.load %arg5[%c0_19, %c0_20, %c0_21] : memref<9x1x96xf32, #tpu.memory_space<vmem>>, vector<1x1x96xf32>
    %22 = vector.shape_cast %21 : vector<1x1x96xf32> to vector<1x96xf32>
    %23 = vector.shape_cast %22 : vector<1x96xf32> to vector<1x1x96xf32>
    %24 = vector.broadcast %23 : vector<1x1x96xf32> to vector<8x16x96xf32>
    %25 = arith.mulf %20, %24 : vector<8x16x96xf32>
    %26 = arith.addf %19, %25 : vector<8x16x96xf32>
    %c0_22 = arith.constant 0 : index
    %c1_23 = arith.constant 1 : index
    %c0_24 = arith.constant 0 : index
    %27 = vector.load %arg8[%c0_22, %c1_23, %c0_24] : memref<10x18x96xf32, #tpu.memory_space<vmem>>, vector<8x16x96xf32>
    %c1_25 = arith.constant 1 : index
    %c0_26 = arith.constant 0 : index
    %c0_27 = arith.constant 0 : index
    %28 = vector.load %arg5[%c1_25, %c0_26, %c0_27] : memref<9x1x96xf32, #tpu.memory_space<vmem>>, vector<1x1x96xf32>
    %29 = vector.shape_cast %28 : vector<1x1x96xf32> to vector<1x96xf32>
    %30 = vector.shape_cast %29 : vector<1x96xf32> to vector<1x1x96xf32>
    %31 = vector.broadcast %30 : vector<1x1x96xf32> to vector<8x16x96xf32>
    %32 = arith.mulf %27, %31 : vector<8x16x96xf32>
    %33 = arith.addf %26, %32 : vector<8x16x96xf32>
    %c0_28 = arith.constant 0 : index
    %c2 = arith.constant 2 : index
    %c0_29 = arith.constant 0 : index
    %34 = vector.load %arg8[%c0_28, %c2, %c0_29] : memref<10x18x96xf32, #tpu.memory_space<vmem>>, vector<8x16x96xf32>
    %c2_30 = arith.constant 2 : index
    %c0_31 = arith.constant 0 : index
    %c0_32 = arith.constant 0 : index
    %35 = vector.load %arg5[%c2_30, %c0_31, %c0_32] : memref<9x1x96xf32, #tpu.memory_space<vmem>>, vector<1x1x96xf32>
    %36 = vector.shape_cast %35 : vector<1x1x96xf32> to vector<1x96xf32>
    %37 = vector.shape_cast %36 : vector<1x96xf32> to vector<1x1x96xf32>
    %38 = vector.broadcast %37 : vector<1x1x96xf32> to vector<8x16x96xf32>
    %39 = arith.mulf %34, %38 : vector<8x16x96xf32>
    %40 = arith.addf %33, %39 : vector<8x16x96xf32>
    %c1_33 = arith.constant 1 : index
    %c0_34 = arith.constant 0 : index
    %c0_35 = arith.constant 0 : index
    %41 = vector.load %arg8[%c1_33, %c0_34, %c0_35] : memref<10x18x96xf32, #tpu.memory_space<vmem>>, vector<8x16x96xf32>
    %c3 = arith.constant 3 : index
    %c0_36 = arith.constant 0 : index
    %c0_37 = arith.constant 0 : index
    %42 = vector.load %arg5[%c3, %c0_36, %c0_37] : memref<9x1x96xf32, #tpu.memory_space<vmem>>, vector<1x1x96xf32>
    %43 = vector.shape_cast %42 : vector<1x1x96xf32> to vector<1x96xf32>
    %44 = vector.shape_cast %43 : vector<1x96xf32> to vector<1x1x96xf32>
    %45 = vector.broadcast %44 : vector<1x1x96xf32> to vector<8x16x96xf32>
    %46 = arith.mulf %41, %45 : vector<8x16x96xf32>
    %47 = arith.addf %40, %46 : vector<8x16x96xf32>
    %c1_38 = arith.constant 1 : index
    %c1_39 = arith.constant 1 : index
    %c0_40 = arith.constant 0 : index
    %48 = vector.load %arg8[%c1_38, %c1_39, %c0_40] : memref<10x18x96xf32, #tpu.memory_space<vmem>>, vector<8x16x96xf32>
    %c4 = arith.constant 4 : index
    %c0_41 = arith.constant 0 : index
    %c0_42 = arith.constant 0 : index
    %49 = vector.load %arg5[%c4, %c0_41, %c0_42] : memref<9x1x96xf32, #tpu.memory_space<vmem>>, vector<1x1x96xf32>
    %50 = vector.shape_cast %49 : vector<1x1x96xf32> to vector<1x96xf32>
    %51 = vector.shape_cast %50 : vector<1x96xf32> to vector<1x1x96xf32>
    %52 = vector.broadcast %51 : vector<1x1x96xf32> to vector<8x16x96xf32>
    %53 = arith.mulf %48, %52 : vector<8x16x96xf32>
    %54 = arith.addf %47, %53 : vector<8x16x96xf32>
    %c1_43 = arith.constant 1 : index
    %c2_44 = arith.constant 2 : index
    %c0_45 = arith.constant 0 : index
    %55 = vector.load %arg8[%c1_43, %c2_44, %c0_45] : memref<10x18x96xf32, #tpu.memory_space<vmem>>, vector<8x16x96xf32>
    %c5 = arith.constant 5 : index
    %c0_46 = arith.constant 0 : index
    %c0_47 = arith.constant 0 : index
    %56 = vector.load %arg5[%c5, %c0_46, %c0_47] : memref<9x1x96xf32, #tpu.memory_space<vmem>>, vector<1x1x96xf32>
    %57 = vector.shape_cast %56 : vector<1x1x96xf32> to vector<1x96xf32>
    %58 = vector.shape_cast %57 : vector<1x96xf32> to vector<1x1x96xf32>
    %59 = vector.broadcast %58 : vector<1x1x96xf32> to vector<8x16x96xf32>
    %60 = arith.mulf %55, %59 : vector<8x16x96xf32>
    %61 = arith.addf %54, %60 : vector<8x16x96xf32>
    %c2_48 = arith.constant 2 : index
    %c0_49 = arith.constant 0 : index
    %c0_50 = arith.constant 0 : index
    %62 = vector.load %arg8[%c2_48, %c0_49, %c0_50] : memref<10x18x96xf32, #tpu.memory_space<vmem>>, vector<8x16x96xf32>
    %c6 = arith.constant 6 : index
    %c0_51 = arith.constant 0 : index
    %c0_52 = arith.constant 0 : index
    %63 = vector.load %arg5[%c6, %c0_51, %c0_52] : memref<9x1x96xf32, #tpu.memory_space<vmem>>, vector<1x1x96xf32>
    %64 = vector.shape_cast %63 : vector<1x1x96xf32> to vector<1x96xf32>
    %65 = vector.shape_cast %64 : vector<1x96xf32> to vector<1x1x96xf32>
    %66 = vector.broadcast %65 : vector<1x1x96xf32> to vector<8x16x96xf32>
    %67 = arith.mulf %62, %66 : vector<8x16x96xf32>
    %68 = arith.addf %61, %67 : vector<8x16x96xf32>
    %c2_53 = arith.constant 2 : index
    %c1_54 = arith.constant 1 : index
    %c0_55 = arith.constant 0 : index
    %69 = vector.load %arg8[%c2_53, %c1_54, %c0_55] : memref<10x18x96xf32, #tpu.memory_space<vmem>>, vector<8x16x96xf32>
    %c7 = arith.constant 7 : index
    %c0_56 = arith.constant 0 : index
    %c0_57 = arith.constant 0 : index
    %70 = vector.load %arg5[%c7, %c0_56, %c0_57] : memref<9x1x96xf32, #tpu.memory_space<vmem>>, vector<1x1x96xf32>
    %71 = vector.shape_cast %70 : vector<1x1x96xf32> to vector<1x96xf32>
    %72 = vector.shape_cast %71 : vector<1x96xf32> to vector<1x1x96xf32>
    %73 = vector.broadcast %72 : vector<1x1x96xf32> to vector<8x16x96xf32>
    %74 = arith.mulf %69, %73 : vector<8x16x96xf32>
    %75 = arith.addf %68, %74 : vector<8x16x96xf32>
    %c2_58 = arith.constant 2 : index
    %c2_59 = arith.constant 2 : index
    %c0_60 = arith.constant 0 : index
    %76 = vector.load %arg8[%c2_58, %c2_59, %c0_60] : memref<10x18x96xf32, #tpu.memory_space<vmem>>, vector<8x16x96xf32>
    %c8 = arith.constant 8 : index
    %c0_61 = arith.constant 0 : index
    %c0_62 = arith.constant 0 : index
    %77 = vector.load %arg5[%c8, %c0_61, %c0_62] : memref<9x1x96xf32, #tpu.memory_space<vmem>>, vector<1x1x96xf32>
    %78 = vector.shape_cast %77 : vector<1x1x96xf32> to vector<1x96xf32>
    %79 = vector.shape_cast %78 : vector<1x96xf32> to vector<1x1x96xf32>
    %80 = vector.broadcast %79 : vector<1x1x96xf32> to vector<8x16x96xf32>
    %81 = arith.mulf %76, %80 : vector<8x16x96xf32>
    %82 = arith.addf %75, %81 : vector<8x16x96xf32>
    %c0_63 = arith.constant 0 : index
    %c0_64 = arith.constant 0 : index
    %83 = vector.load %arg6[%c0_63, %c0_64] : memref<1x96xf32, #tpu.memory_space<vmem>>, vector<1x96xf32>
    %84 = vector.shape_cast %83 : vector<1x96xf32> to vector<1x1x96xf32>
    %85 = vector.broadcast %84 : vector<1x1x96xf32> to vector<8x16x96xf32>
    %86 = arith.addf %82, %85 : vector<8x16x96xf32>
    %c0_65 = arith.constant 0 : index
    %c0_66 = arith.constant 0 : index
    %c0_67 = arith.constant 0 : index
    %c0_68 = arith.constant 0 : index
    %87 = vector.load %arg7[%c0_65, %c0_66, %c0_67, %c0_68] : memref<1x8x16x96xf32, #tpu.memory_space<vmem>>, vector<1x8x16x96xf32>
    %88 = vector.shape_cast %87 : vector<1x8x16x96xf32> to vector<8x16x96xf32>
    %89 = vector.shape_cast %86 : vector<8x16x96xf32> to vector<1x8x16x96xf32>
    tpu.vector_store %arg7[%c0_65, %c0_66, %c0_67, %c0_68], %89 {strides = array<i32>} : memref<1x8x16x96xf32, #tpu.memory_space<vmem>>, vector<1x8x16x96xf32>,
    return
  }
  func.func @transform_0(%arg0: i32, %arg1: i32) -> (i32, i32, i32, i32) {
    %c2_i32 = arith.constant 2 : i32
    %0 = arith.muli %arg0, %c2_i32 : i32
    %1 = arith.addi %0, %arg1 : i32
    %c0_i32 = arith.constant 0 : i32
    %c0_i32_0 = arith.constant 0 : i32
    %c0_i32_1 = arith.constant 0 : i32
    %c0_i32_2 = arith.constant 0 : i32
    return %1, %c0_i32, %c0_i32_0, %c0_i32_1 : i32, i32, i32, i32
  }
  func.func @transform_1(%arg0: i32, %arg1: i32) -> (i32, i32) {
    %c0_i32 = arith.constant 0 : i32
    %c0_i32_0 = arith.constant 0 : i32
    %c0_i32_1 = arith.constant 0 : i32
    return %c0_i32, %c0_i32_0 : i32, i32
  }
  func.func @transform_2(%arg0: i32, %arg1: i32) -> (i32, i32) {
    %c0_i32 = arith.constant 0 : i32
    %c0_i32_0 = arith.constant 0 : i32
    %c0_i32_1 = arith.constant 0 : i32
    return %c0_i32, %c0_i32_0 : i32, i32
  }
  func.func @transform_3(%arg0: i32, %arg1: i32) -> (i32, i32, i32) {
    %c0_i32 = arith.constant 0 : i32
    %c0_i32_0 = arith.constant 0 : i32
    %c0_i32_1 = arith.constant 0 : i32
    %c0_i32_2 = arith.constant 0 : i32
    return %c0_i32, %c0_i32_0, %c0_i32_1 : i32, i32, i32
  }
  func.func @transform_4(%arg0: i32, %arg1: i32) -> (i32, i32) {
    %c0_i32 = arith.constant 0 : i32
    %c0_i32_0 = arith.constant 0 : i32
    %c0_i32_1 = arith.constant 0 : i32
    return %c0_i32, %c0_i32_0 : i32, i32
  }
  func.func @transform_5(%arg0: i32, %arg1: i32) -> (i32, i32, i32, i32) {
    %c2_i32 = arith.constant 2 : i32
    %0 = arith.muli %arg0, %c2_i32 : i32
    %1 = arith.addi %0, %arg1 : i32
    %c0_i32 = arith.constant 0 : i32
    %c0_i32_0 = arith.constant 0 : i32
    %c0_i32_1 = arith.constant 0 : i32
    %c0_i32_2 = arith.constant 0 : i32
    return %1, %c0_i32, %c0_i32_0, %c0_i32_1 : i32, i32, i32, i32
  }
}

</mosaic_0001>

<bundles_post_ra>
// kernel: tpu_custom_call.1
= control target key start
LH: loop header
LB: loop body
LE: loop exit
PB: predicated region body
PF: predicated region fallthrough
CT: control target
= control target key end

     0   :  { %s2341_s0 = inlined_call_operand.hbm [shape: f32[4,10,16,32], index: 0, kind: input, shape index: {}]   ;;  %s2342_s1 = inlined_call_operand.hbm [shape: f32[32,96], index: 1, kind: input, shape index: {}]   ;;  %s2343_s2 = inlined_call_operand.vmem [shape: f32[1,96], index: 2, kind: input, shape index: {}]   ;;  %s2344_s3 = inlined_call_operand.vmem [shape: f32[9,1,96], index: 3, kind: input, shape index: {}]   ;;  %s2345_s4 = inlined_call_operand.vmem [shape: f32[1,96], index: 4, kind: input, shape index: {}]   ;;  %s2346_s5 = inlined_call_operand.hbm [shape: f32[4,8,16,96], index: 5, kind: output, shape index: {}]  }
   0x1   :  { %2357 = sst [smem:[#allocation16_spill]] %s2342_s1 }
   0x2   :  { %10 = vsyncpa [#allocation4], 0 }
   0x3   :  { %12 = vsyncpa [#allocation4 + $0x1], 0 }
   0x4   :  { %13 = vsyncpa [#allocation7], 0 }
   0x5   :  { %14 = vsyncpa [#allocation5], 0 }
   0x6   :  { %16 = vsyncpa [#allocation5 + $0x1], 0  ;;  %s1723_s18 = smov 0   ;;  %s1725_s19 = smov 0  }
   0x7   :  { %s1727_s20 = smov 0   ;;  %s1729_s21 = smov 0  }
   0x8   :  { %s1731_s22 = smov 0   ;;  %s1733_s23 = smov 0  }
   0x9   :  { %s1735_s24 = smov 0   ;;  %s1737_s25 = smov 0  }
   0xa LB: > { %2358 = sst [smem:[#allocation12_spill]] %s1653_s18  ;;  %s1286_s26 = sadd.s32 4294967295, %s1681_s25   ;;  %s1681_s25 = sphi %s1737_s25, %s22_s25   ;;  %s1677_s24 = sphi %s1735_s24, %s2388_s24   ;;  %s1673_s23 = sphi %s1733_s23, %s2387_s23   ;;  %s1669_s22 = sphi %s1731_s22, %s2383_s22   ;;  %s1665_s21 = sphi %s1729_s21, %s2382_s21   ;;  %s1661_s20 = sphi %s1727_s20, %s2386_s20   ;;  %s1657_s19 = sphi %s1725_s19, %s2385_s19   ;;  %s1653_s18 = sphi %s1723_s18, %s2384_s18  }
   0xb   : > { %2359 = sst [smem:[#allocation13_spill]] %s1673_s23  ;;  %s1287_s27 = sadd.s32 4294967294, %s1681_s25  }
   0xc   : > { %2360 = sst [smem:[#allocation14_spill]] %s1677_s24  ;;  %p58_p0 = scmp.ne.s32.totalorder %s1657_s19, %s1653_s18 }
   0xd   : > { %p1767_p1 = scmp.eq.s32.totalorder %s1286_s26, 0  ;;  %p1771_p2 = scmp.eq.s32.totalorder %s1286_s26, 3 }
   0xe   : > { %p176_p3 = scmp.eq.s32.totalorder %s1287_s27, 3  ;;  %p1292_p5 = scmp.ge.s32.totalorder %s1681_s25, 1 }
   0xf   : > { %s2361_s28 = scalar_select %p1767_p1, 1, 0 }
  0x10   : > { %s2362_s29 = scalar_select %p1771_p2, 1, 0 }
  0x11   : > { %p1777_p4 = por %p1767_p1, %p58_p0  ;;  %p1782_p6 = por %p176_p3, %p58_p0 }
  0x12   : > { %p183_p7 = scmp.lt.s32.totalorder %s1681_s25, 5  ;;  %s1683_s8 = smov [#allocation6]  }
  0x13   : > { %s2363_s30 = scalar_select %p1777_p4, 1, 0 }
  0x14   : > { %s2364_s6 = scalar_select %p1782_p6, 1, 0 }
  0x15   : > { %p1787_p8 = pnand %p1292_p5, %p183_p7  ;;  %s195_s9 = sshll.u32 %s1683_s8, 4  ;;  %s196_s9 = int_to_ptr.vmem [resolvable:$true] %s195_s9 }
  0x16   : > { %2365 = sst [smem:[#allocation15_spill]] %s2364_s6  ;;  %s2368_s1 = sld [smem:[#allocation16_spill]] }
  0x17   : > { %s2366_s7 = scalar_select %p1787_p8, 1, 0 }
  0x18   : > { %p1433_p9 = pneg %p1787_p8 }
  0x1a   : > { %p1795_p10 = pnand %p1433_p9, %p1767_p1 }
  0x1c   : > { %s1521_s13 = scalar_lea.hbm %s2368_s1, 512  ;;  %p1523_p12 = pneg %p1795_p10 }
  0x1d   : > { %p1522_p11 = scmp.ne.s32.totalorder %s2368_s1, %s1521_s13  ;;  %p1528_p3 = scmp.lt.u32.totalorder %s1521_s13, %s2368_s1 }
  0x1f   : > { %p1524_p13 = pnand %p1523_p12, %p1522_p11 }
  0x21   : > { %p1525_p0 = pneg %p1524_p13 }
  0x23   : > { %p1530_p5 = pnand %p1528_p3, %p1525_p0 }
  0x25   : > { %1533 = shalt.err (!%p1530_p5)
}
  0x26   : > { %s1534_s26 = scalar_lea.vmem %s196_s9, 512  ;;  %p1542_p1 = scmp.lt.s32.totalorder %s196_s9, %s196_s9 }
  0x27   : > { %p1535_p7 = scmp.ne.s32.totalorder %s196_s9, %s1534_s26  ;;  %p1543_p4 = scmp.lt.s32.totalorder %s1534_s26, %s1534_s26 }
  0x29   : > { %p1537_p9 = pnand %p1535_p7, %p1523_p12  ;;  %p1544_p8 = por %p1543_p4, %p1542_p1 }
  0x2b   : > { %p1538_p6 = pneg %p1537_p9 }
  0x2d   : > { %p1545_p2 = pnand %p1544_p8, %p1538_p6 }
  0x2f   : > { %1548 = shalt.err (!%p1545_p2)
}
  0x30   : > { %s2351_s27 = smov 128   ;;  %s2352_s8 = smov 8  }
  0x31   : > { %1436 = dma.hbm_to_vmem [thread:$0]  (!%p1795_p10), %s2368_s1, 512, %s196_s9, [#allocation7], %s2351_s27, %s2351_s27, %s2352_s8  }
  0x32   : > { %s31_s13 = sadd.s32 1, %s1673_s23  ;;  %s34_s14 = sadd.s32 1, %s1677_s24 }
  0x33   : > { %p32_p1 = scmp.ge.s32.totalorder %s31_s13, 2  ;;  %s1288_s15 = sshll.u32 %s1677_s24, 1 }
  0x34   : > { %s45_s16 = sadd.s32 1, %s1661_s20  ;;  %s39_s17 = sadd.s32 %s1673_s23, %s1288_s15 }
  0x35   : > { %s2390_s13 = smov (%p32_p1, %s31_s13), 0  ;;  %s2392_s14 = smov (!%p32_p1, %s34_s14), %s1677_s24 }
  0x36   : > { %p52_p2 = scmp.ne.s32.totalorder %s1661_s20, %s1657_s19  ;;  %p36_p4 = scmp.ge.s32.totalorder %s2392_s14, 2 }
  0x37   : > { %p53_p6 = scmp.eq.s32.totalorder %s1681_s25, 0  ;;  %p2369_p8 = scmp.ne.s32.totalorder %s2362_s29, 0 }
  0x38   : > { %p1446_p10 = scmp.lt.s32.totalorder %s1681_s25, 4  ;;  %s2394_s14 = smov (%p36_p4, %s2392_s14), 0 }
  0x39   : > { %p1831_p11 = por %p2369_p8, %p52_p2  ;;  %p1838_p12 = por %p53_p6, %p52_p2 }
  0x3a   : > { %s218_s26 = sand.u32 1, %s1661_s20   ;;  %s1289_s11 = sshll.u32 %s2394_s14, 1 }
  0x3b   : > { %s41_s12 = sadd.s32 %s1289_s11, %s2390_s13  ;;  %s1422_s15 = smul.u32 160, %s218_s26 }
  0x3c   : > { %s42_s27 = ssub.s32 %s39_s17, %s41_s12  ;;  %s1423_s29 = smul.u32 2560, %s39_s17 }
  0x3d   : > { %p43_p13 = scmp.eq.s32.totalorder %s42_s27, 0  ;;  %s222_s23 = scalar_lea.vmem [#allocation3], %s1422_s15 }
  0x3e   : > { %s1848_s24 = scalar_lea.hbm %s2341_s0, %s1423_s29  ;;  %s231_s6 = sshll.u32 %s222_s23, 4  ;;  %s1853_s6 = int_to_ptr.vmem [resolvable:$true] %s231_s6 }
  0x3f   : > { %s1851_s18 = scalar_select %p43_p13, %s1661_s20, %s45_s16  }
  0x40   : > { %p1859_p0 = pnand %p1446_p10, %p1838_p12  ;;  %s1863_s1 = scalar_lea.sflag [#allocation4], %s218_s26 }
  0x41   : > { %s1549_s27 = scalar_lea.hbm %s1848_s24, 2560  ;;  %s1554_s16 = scalar_lea.hbm %s2341_s0, 10240 }
  0x42   : > { %p1550_p3 = scmp.ne.s32.totalorder %s1848_s24, %s1549_s27  ;;  %p1551_p5 = pneg %p1859_p0 }
  0x43   : > { %p1555_p1 = scmp.lt.u32.totalorder %s1848_s24, %s2341_s0  ;;  %p1556_p2 = scmp.lt.u32.totalorder %s1554_s16, %s1549_s27 }
  0x44   : > { %p1552_p7 = pnand %p1551_p5, %p1550_p3  ;;  %p1558_p6 = scmp.lt.u32.totalorder %s1549_s27, %s1848_s24 }
  0x45   : > { %p1557_p4 = por %p1556_p2, %p1555_p1 }
  0x46   : > { %p1553_p9 = pneg %p1552_p7 }
  0x47   : > { %p1559_p8 = por %p1558_p6, %p1557_p4 }
  0x49   : > { %p1560_p10 = pnand %p1559_p8, %p1553_p9 }
  0x4b   : > { %1563 = shalt.err (!%p1560_p10)
}
  0x4c   : > { %s1564_s26 = scalar_lea.vmem %s1853_s6, 2560  ;;  %s1686_s12 = smov [#allocation3]  }
  0x4d   : > { %p1565_p12 = scmp.ne.s32.totalorder %s1853_s6, %s1564_s26  ;;  %s1569_s15 = sshll.u32 %s1686_s12, 4  ;;  %s1570_s15 = int_to_ptr.vmem [resolvable:$false] %s1569_s15 }
  0x4e   : > { %s1571_s29 = scalar_lea.vmem %s1570_s15, 5120  ;;  %p1572_p7 = scmp.lt.s32.totalorder %s1853_s6, %s1570_s15 }
  0x4f   : > { %p1567_p13 = pnand %p1565_p12, %p1551_p5  ;;  %p1573_p1 = scmp.lt.s32.totalorder %s1571_s29, %s1564_s26 }
  0x51   : > { %p1568_p3 = pneg %p1567_p13  ;;  %p1574_p2 = por %p1573_p1, %p1572_p7 }
  0x53   : > { %p1575_p4 = pnand %p1574_p2, %p1568_p3 }
  0x55   : > { %1578 = shalt.err (!%p1575_p4)
}
  0x56   : > { %s2373_s27 = smov 8   ;;  %s2374_s23 = smov 128  }
  0x57   : > { %1440 = dma.hbm_to_vmem [thread:$0]  (!%p1859_p0), %s1848_s24, 2560, %s1853_s6, %s1863_s1, %s2374_s23, %s2374_s23, %s2373_s27  }
  0x58   : > { %p2375_p5 = scmp.ne.s32.totalorder %s2366_s7, 0 }
  0x59   : > { %s1897_s8 = sand.u32 (!%p2375_p5), 1, %s1657_s19   ;;  %p2376_p9 = scmp.ne.s32.totalorder (!%p2375_p5), %s2363_s30, 0 }
  0x5a   : > { %243 = sbr.rel (%p2375_p5) target bundleno = 454 (0x1c6), region = 40  ;;  %s246_s9 = scalar_lea.sflag (!%p2375_p5), [#allocation4], %s1897_s8 }
  0x5b   : > { %s1424_s16 = smul.u32 (!%p2375_p5), 160, %s1897_s8 }
  0x5d   : > { %s1901_s11 = scalar_lea.vmem (!%p2375_p5), [#allocation3], %s1424_s16 }
  0x61   : > { %1640 = dma.done.wait (%p2376_p9), %s246_s9, 2560  }
  0x62   : > { %1642 = vsyncadd (%p2376_p9), %s246_s9, 4294964736  ;;  %p2377_p0 = scmp.ne.s32.totalorder %s2361_s28, 0 }
  0x64   : > { %1644 = dma.done.wait (%p2377_p0), [#allocation7], 512  }
  0x65   : > { %1646 = vsyncadd (%p2377_p0), [#allocation7], 4294966784  ;;  %s1299_s24 = sshll.u32 %s1897_s8, 7  ;;  %vm308_vm0 = vcmask 261120   ;;  %v304_v0 = vld [vmem:[#allocation6] sm:$0xff]  ;;  %v305_v1 = vld [vmem:[#allocation6 + $0x8] sm:$0xff] }
  0x66   : > { %v306_v2 = vld [vmem:[#allocation6 + $0x10] sm:$0xff]  ;;  %v1410_v3 = vpack.c.bf16 %v305_v1, %v304_v0  ;;  %v307_v4 = vld [vmem:[#allocation6 + $0x18] sm:$0xff]  ;;  %v284_v5 = vld [vmem:[%s1901_s11] sm:$0xff]  ;;  %vm561_vm1 = vcmask 785408   ;;  %vm564_vm2 = vcmask 779264   ;;  %v1687_v26 = vmov 0.0  }
  0x67   : > { %v294_v6 = vld [vmem:[%s1901_s11 + $0x50] sm:$0xff]  ;;  %v1414_v7 = vpack.c.bf16 %v307_v4, %v306_v2  ;;  %1380 = vmatprep.mubr.msk.f32.mxu0 %vm308_vm0, %v284_v5  ;;  %v285_v8 = vld [vmem:[%s1901_s11 + $0x8] sm:$0xff]  ;;  %v295_v9 = vld [vmem:[%s1901_s11 + $0x58] sm:$0xff]  ;;  %563 = vst.msk [vmem:[#allocation2 + $0x8] sm:$0xff] %vm561_vm1, %v1687_v26  ;;  %s2007_s6 = scalar_lea.vmem [#allocation8], %s1299_s24  ;;  %p1321_p6 = scmp.ne.s32.totalorder %s1665_s21, 0 }
  0x68   : > { %1395 = vmatprep.mubr.msk.f32.mxu1 %vm308_vm0, %v294_v6  ;;  %1411 = vmatprep.subr.bf16.mxu0 %v1410_v3  ;;  %v286_v10 = vld [vmem:[%s1901_s11 + $0x10] sm:$0xff]  ;;  %v296_v11 = vld [vmem:[%s1901_s11 + $0x60] sm:$0xff]  ;;  %v287_v12 = vld [vmem:[%s1901_s11 + $0x18] sm:$0xff]  ;;  %565 = vst.msk [vmem:[#allocation2 + $0x10] sm:$0x3] %vm564_vm2, %v1687_v26  ;;  %v1688_v4 = vmov (!%p1321_p6), 0.0  }
  0x69   : > { %1418 = vmatprep.subr.bf16.mxu1 %v1410_v3  ;;  %1413 = vmatpush3.bf16.msra.mxu0 %v1410_v3  ;;  %v297_v13 = vld [vmem:[%s1901_s11 + $0x68] sm:$0xff]  ;;  %v288_v14 = vld [vmem:[%s1901_s11 + $0x20] sm:$0xff]  ;;  %v298_v15 = vld [vmem:[%s1901_s11 + $0x70] sm:$0xff]  ;;  %562 = vst.msk [vmem:[#allocation2] sm:$0xff] %vm561_vm1, %v1687_v26 }
  0x6a   : > { %1420 = vmatpush3.bf16.msra.mxu1 %v1410_v3  ;;  %1415 = vmatprep.subr.bf16.mxu0 %v1414_v7  ;;  %v289_v16 = vld [vmem:[%s1901_s11 + $0x28] sm:$0xff]  ;;  %v299_v17 = vld [vmem:[%s1901_s11 + $0x78] sm:$0xff]  ;;  %v290_v18 = vld [vmem:[%s1901_s11 + $0x30] sm:$0xff]  ;;  %566 = vst.msk [vmem:[#allocation2 + $0x18] sm:$0xff] %vm561_vm1, %v1687_v26 }
  0x6b   : > { %1419 = vmatprep.subr.bf16.mxu1 %v1414_v7  ;;  %v300_v19 = vld [vmem:[%s1901_s11 + $0x80] sm:$0xff]  ;;  %v291_v20 = vld [vmem:[%s1901_s11 + $0x38] sm:$0xff]  ;;  %v301_v21 = vld [vmem:[%s1901_s11 + $0x88] sm:$0xff]  ;;  %567 = vst.msk [vmem:[#allocation2 + $0x20] sm:$0xff] %vm561_vm1, %v1687_v26 }
  0x6c   : > { %v292_v22 = vld [vmem:[%s1901_s11 + $0x40] sm:$0xff]  ;;  %v302_v23 = vld [vmem:[%s1901_s11 + $0x90] sm:$0xff]  ;;  %v293_v24 = vld [vmem:[%s1901_s11 + $0x48] sm:$0xff]  ;;  %568 = vst.msk [vmem:[#allocation2 + $0x28] sm:$0x3] %vm564_vm2, %v1687_v26 }
  0x6d   : > { %1417 = vmatpush3.bf16.msra.mxu0 %v1414_v7  ;;  %v303_v25 = vld [vmem:[%s1901_s11 + $0x98] sm:$0xff]  ;;  %569 = vst.msk [vmem:[#allocation2 + $0x30] sm:$0xff] %vm561_vm1, %v1687_v26  ;;  %570 = vst.msk [vmem:[#allocation2 + $0x38] sm:$0xff] %vm561_vm1, %v1687_v26  ;;  %v1320_v27 = vld [vmem:[%s2343_s2] ss:$0 sm:$0xff] }
  0x6e   : > { %1421 = vmatpush3.bf16.msra.mxu1 %v1414_v7  ;;  %571 = vst.msk [vmem:[#allocation2 + $0x40] sm:$0x3] %vm564_vm2, %v1687_v26  ;;  %574 = vst.msk [vmem:[#allocation2 + $0x58] sm:$0x3] %vm564_vm2, %v1687_v26 }
  0x6f   : > { %572 = vst.msk [vmem:[#allocation2 + $0x48] sm:$0xff] %vm561_vm1, %v1687_v26  ;;  %573 = vst.msk [vmem:[#allocation2 + $0x50] sm:$0xff] %vm561_vm1, %v1687_v26 }
  0x70   : > { %1381 = vmatmul.mubr.msk.f32.vlgmr.msra.gmra.mrb[0].mxu0 %vm308_vm0, %v285_v8  ;;  %575 = vst.msk [vmem:[#allocation2 + $0x60] sm:$0xff] %vm561_vm1, %v1687_v26  ;;  %576 = vst.msk [vmem:[#allocation2 + $0x68] sm:$0xff] %vm561_vm1, %v1687_v26 }
  0x71   : > { %1396 = vmatmul.mubr.msk.f32.vlgmr.msra.gmra.mrb[0].mxu1 %vm308_vm0, %v295_v9  ;;  %1383 = vmatprep.mubr.msk.f32.mxu0 %vm308_vm0, %v286_v10  ;;  %577 = vst.msk [vmem:[#allocation2 + $0x70] sm:$0x3] %vm564_vm2, %v1687_v26  ;;  %580 = vst.msk [vmem:[#allocation2 + $0x88] sm:$0x3] %vm564_vm2, %v1687_v26 }
  0x72   : > { %1398 = vmatprep.mubr.msk.f32.mxu1 %vm308_vm0, %v296_v11  ;;  %578 = vst.msk [vmem:[#allocation2 + $0x78] sm:$0xff] %vm561_vm1, %v1687_v26  ;;  %579 = vst.msk [vmem:[#allocation2 + $0x80] sm:$0xff] %vm561_vm1, %v1687_v26 }
  0x73   : > { %581 = vst.msk [vmem:[#allocation2 + $0x90] sm:$0xff] %vm561_vm1, %v1687_v26  ;;  %582 = vst.msk [vmem:[#allocation2 + $0x98] sm:$0xff] %vm561_vm1, %v1687_v26 }
  0x74   : > { %1384 = vmatmul.mubr.msk.f32.gmra.mrb[2].mxu0 %vm308_vm0, %v287_v12  ;;  %583 = vst.msk [vmem:[#allocation2 + $0xa0] sm:$0x3] %vm564_vm2, %v1687_v26  ;;  %586 = vst.msk [vmem:[#allocation2 + $0xb8] sm:$0x3] %vm564_vm2, %v1687_v26 }
  0x75   : > { %1399 = vmatmul.mubr.msk.f32.gmra.mrb[2].mxu1 %vm308_vm0, %v297_v13  ;;  %1386 = vmatprep.mubr.msk.f32.mxu0 %vm308_vm0, %v288_v14  ;;  %584 = vst.msk [vmem:[#allocation2 + $0xa8] sm:$0xff] %vm561_vm1, %v1687_v26  ;;  %585 = vst.msk [vmem:[#allocation2 + $0xb0] sm:$0xff] %vm561_vm1, %v1687_v26 }
  0x76   : > { %1401 = vmatprep.mubr.msk.f32.mxu1 %vm308_vm0, %v298_v15  ;;  %587 = vst.msk [vmem:[#allocation2 + $0xc0] sm:$0xff] %vm561_vm1, %v1687_v26  ;;  %588 = vst.msk [vmem:[#allocation2 + $0xc8] sm:$0xff] %vm561_vm1, %v1687_v26 }
  0x77   : > { %589 = vst.msk [vmem:[#allocation2 + $0xd0] sm:$0x3] %vm564_vm2, %v1687_v26  ;;  %592 = vst.msk [vmem:[#allocation2 + $0xe8] sm:$0x3] %vm564_vm2, %v1687_v26 }
  0x78   : > { %1387 = vmatmul.mubr.msk.f32.gmra.mrb[4].mxu0 %vm308_vm0, %v289_v16  ;;  %590 = vst.msk [vmem:[#allocation2 + $0xd8] sm:$0xff] %vm561_vm1, %v1687_v26  ;;  %591 = vst.msk [vmem:[#allocation2 + $0xe0] sm:$0xff] %vm561_vm1, %v1687_v26 }
  0x79   : > { %1402 = vmatmul.mubr.msk.f32.gmra.mrb[4].mxu1 %vm308_vm0, %v299_v17  ;;  %1389 = vmatprep.mubr.msk.f32.mxu0 %vm308_vm0, %v290_v18 }
  0x7a   : > { %1404 = vmatprep.mubr.msk.f32.mxu1 %vm308_vm0, %v300_v19 }
  0x7c   : > { %1390 = vmatmul.mubr.msk.f32.gmra.mrb[6].mxu0 %vm308_vm0, %v291_v20 }
  0x7d   : > { %1405 = vmatmul.mubr.msk.f32.gmra.mrb[6].mxu1 %vm308_vm0, %v301_v21  ;;  %1392 = vmatprep.mubr.msk.f32.mxu0 %vm308_vm0, %v292_v22 }
  0x7e   : > { %1407 = vmatprep.mubr.msk.f32.mxu1 %vm308_vm0, %v302_v23 }
  0x80   : > { %1393 = vmatmul.mubr.msk.f32.gmra.mrb[8].mxu0 %vm308_vm0, %v293_v24 }
  0x81   : > { %1408 = vmatmul.mubr.msk.f32.gmra.mrb[8].mxu1 %vm308_vm0, %v303_v25 }
 0x143   : > { %v1382_v28 = vpop.f32.mrb[0].mxu0 }
 0x144   : > { %v1397_v29 = vpop.f32.mrb[0].mxu1  ;;  %v542_v30 = vadd.f32 %v1382_v28, %v1320_v27  ;;  %v435_v32 = vpop.f32.mrb[1].mxu0 }
 0x145   : > { %v552_v31 = vadd.f32 %v1397_v29, %v1320_v27  ;;  %v485_v33 = vpop.f32.mrb[1].mxu1  ;;  %v541_v34 = vadd.f32 %v1320_v27, %v435_v32 }
 0x146   : > { %v551_v35 = vadd.f32 %v1320_v27, %v485_v33  ;;  %594 = vst.msk [vmem:[#allocation2 + $0x9] sm:$0xff] %vm561_vm1, %v542_v30 }
 0x147   : > { %604 = vst.msk [vmem:[#allocation2 + $0x81] sm:$0xff] %vm561_vm1, %v552_v31  ;;  %593 = vst.msk [vmem:[#allocation2 + $0x1] sm:$0xff] %vm561_vm1, %v541_v34  ;;  %v1385_v36 = vpop.f32.mrb[2].mxu0 }
 0x148   : > { %603 = vst.msk [vmem:[#allocation2 + $0x79] sm:$0xff] %vm561_vm1, %v551_v35  ;;  %v1400_v37 = vpop.f32.mrb[2].mxu1  ;;  %v544_v38 = vadd.f32 %v1385_v36, %v1320_v27  ;;  %v445_v40 = vpop.f32.mrb[3].mxu0  ;;  %617 = vst.msk [vmem:[#allocation2] sm:$0xff] (!%p1321_p6), %vm561_vm1, %v1688_v4 }
 0x149   : > { %v554_v39 = vadd.f32 %v1400_v37, %v1320_v27  ;;  %v495_v41 = vpop.f32.mrb[3].mxu1  ;;  %v543_v42 = vadd.f32 %v1320_v27, %v445_v40  ;;  %618 = vst.msk [vmem:[#allocation2 + $0x8] sm:$0xff] (!%p1321_p6), %vm561_vm1, %v1688_v4 }
 0x14a   : > { %v553_v43 = vadd.f32 %v1320_v27, %v495_v41  ;;  %596 = vst.msk [vmem:[#allocation2 + $0x21] sm:$0xff] %vm561_vm1, %v544_v38 }
 0x14b   : > { %606 = vst.msk [vmem:[#allocation2 + $0x99] sm:$0xff] %vm561_vm1, %v554_v39  ;;  %595 = vst.msk [vmem:[#allocation2 + $0x19] sm:$0xff] %vm561_vm1, %v543_v42  ;;  %v1388_v44 = vpop.f32.mrb[4].mxu0 }
 0x14c   : > { %605 = vst.msk [vmem:[#allocation2 + $0x91] sm:$0xff] %vm561_vm1, %v553_v43  ;;  %v1403_v45 = vpop.f32.mrb[4].mxu1  ;;  %v546_v46 = vadd.f32 %v1388_v44, %v1320_v27  ;;  %v455_v48 = vpop.f32.mrb[5].mxu0 }
 0x14d   : > { %v556_v47 = vadd.f32 %v1403_v45, %v1320_v27  ;;  %v505_v49 = vpop.f32.mrb[5].mxu1  ;;  %v545_v50 = vadd.f32 %v1320_v27, %v455_v48  ;;  %619 = vst.msk [vmem:[#allocation2 + $0x10] sm:$0x3] (!%p1321_p6), %vm564_vm2, %v1688_v4 }
 0x14e   : > { %v555_v51 = vadd.f32 %v1320_v27, %v505_v49  ;;  %598 = vst.msk [vmem:[#allocation2 + $0x39] sm:$0xff] %vm561_vm1, %v546_v46 }
 0x14f   : > { %608 = vst.msk [vmem:[#allocation2 + $0xb1] sm:$0xff] %vm561_vm1, %v556_v47  ;;  %597 = vst.msk [vmem:[#allocation2 + $0x31] sm:$0xff] %vm561_vm1, %v545_v50  ;;  %v1391_v52 = vpop.f32.mrb[6].mxu0 }
 0x150   : > { %607 = vst.msk [vmem:[#allocation2 + $0xa9] sm:$0xff] %vm561_vm1, %v555_v51  ;;  %v1406_v53 = vpop.f32.mrb[6].mxu1  ;;  %v548_v54 = vadd.f32 %v1391_v52, %v1320_v27  ;;  %v465_v56 = vpop.f32.mrb[7].mxu0 }
 0x151   : > { %v558_v55 = vadd.f32 %v1406_v53, %v1320_v27  ;;  %v515_v57 = vpop.f32.mrb[7].mxu1  ;;  %v547_v58 = vadd.f32 %v1320_v27, %v465_v56 }
 0x152   : > { %v557_v59 = vadd.f32 %v1320_v27, %v515_v57  ;;  %600 = vst.msk [vmem:[#allocation2 + $0x51] sm:$0xff] %vm561_vm1, %v548_v54  ;;  %616 = sbr.rel (%p1321_p6) target bundleno = 345 (0x159), region = 52 }
 0x153   : > { %610 = vst.msk [vmem:[#allocation2 + $0xc9] sm:$0xff] %vm561_vm1, %v558_v55  ;;  %599 = vst.msk [vmem:[#allocation2 + $0x49] sm:$0xff] %vm561_vm1, %v547_v58  ;;  %v1394_v60 = vpop.f32.mrb[8].mxu0 }
 0x154   : > { %609 = vst.msk [vmem:[#allocation2 + $0xc1] sm:$0xff] %vm561_vm1, %v557_v59  ;;  %v1409_v61 = vpop.f32.mrb[8].mxu1  ;;  %v550_v62 = vadd.f32 %v1394_v60, %v1320_v27  ;;  %v475_v0 = vpop.f32.mrb[9].mxu0 }
 0x155   : > { %v560_v63 = vadd.f32 %v1409_v61, %v1320_v27  ;;  %v525_v1 = vpop.f32.mrb[9].mxu1  ;;  %v549_v2 = vadd.f32 %v1320_v27, %v475_v0 }
 0x156   : > { %v559_v3 = vadd.f32 %v1320_v27, %v525_v1  ;;  %602 = vst.msk [vmem:[#allocation2 + $0x69] sm:$0xff] %vm561_vm1, %v550_v62 }
 0x157   : > { %612 = vst.msk [vmem:[#allocation2 + $0xe1] sm:$0xff] %vm561_vm1, %v560_v63  ;;  %601 = vst.msk [vmem:[#allocation2 + $0x61] sm:$0xff] %vm561_vm1, %v549_v2 }
 0x158   : > { %611 = vst.msk [vmem:[#allocation2 + $0xd9] sm:$0xff] %vm561_vm1, %v559_v3 }
 0x159 PF: > { %p1322_p8 = scmp.ne.s32.totalorder %s1665_s21, 1 }
 0x15a   : > { %v1689_v5 = vmov (!%p1322_p8), 0.0  }
 0x15b   : > { %623 = sbr.rel (%p1322_p8) target bundleno = 354 (0x162), region = 56  ;;  %625 = vst.msk [vmem:[#allocation2 + $0xd8] sm:$0xff] (!%p1322_p8), %vm561_vm1, %v1689_v5  ;;  %626 = vst.msk [vmem:[#allocation2 + $0xe0] sm:$0xff] (!%p1322_p8), %vm561_vm1, %v1689_v5 }
 0x15c   : > { %627 = vst.msk [vmem:[#allocation2 + $0xe8] sm:$0x3] (!%p1322_p8), %vm564_vm2, %v1689_v5 }
 0x162 PF: > { %v628_v6 = vld [vmem:[#allocation2] sm:$0xff]  ;;  %v796_v15 = vld [vmem:[#allocation2 + $0x18] sm:$0xff]  ;;  %v965_v28 = vld [vmem:[#allocation2 + $0x30] sm:$0xff]  ;;  %s1342_s15 = sshll.u32 %s1669_s22, 1  ;;  %s1188_s27 = sshll.u32 %s2007_s6, 4  ;;  %s2284_s27 = int_to_ptr.vmem [resolvable:$true] %s1188_s27 }
 0x163   : > { %v2020_v7 = vld [vmem:[%s2344_s3] ss:$0 sm:$0xff]  ;;  %v683_v8 = vld [vmem:[#allocation2 + $0x1] sm:$0xff]  ;;  %v1021_v35 = vld [vmem:[#allocation2 + $0x31] sm:$0xff]  ;;  %s1181_s29 = sadd.s32 %s1665_s21, %s1342_s15  ;;  %s1173_s21 = scalar_lea.sflag [#allocation5], %s1897_s8 }
 0x164   : > { %v651_v9 = vmul.f32 %v2020_v7, %v628_v6  ;;  %v2026_v10 = vld [vmem:[%s2344_s3 + $0x1] ss:$0 sm:$0xff]  ;;  %v739_v11 = vld [vmem:[#allocation2 + $0x2] sm:$0xff]  ;;  %v852_v17 = vld [vmem:[#allocation2 + $0x19] sm:$0xff]  ;;  %v653_v21 = vmul.f32 %v2020_v7, %v796_v15  ;;  %v655_v55 = vmul.f32 %v2020_v7, %v965_v28  ;;  %s1347_s22 = sshll.u32 %s1181_s29, 11  ;;  %s1579_s11 = scalar_lea.vmem %s2284_s27, 2048 }
 0x165   : > { %v2031_v12 = vld [vmem:[%s2344_s3 + $0x2] ss:$0 sm:$0xff]  ;;  %v707_v13 = vmul.f32 %v2026_v10, %v683_v8  ;;  %v2038_v16 = vld [vmem:[%s2344_s3 + $0x3] ss:$0 sm:$0xff]  ;;  %v2043_v18 = vld [vmem:[%s2344_s3 + $0x4] ss:$0 sm:$0xff]  ;;  %v709_v22 = vmul.f32 %v2026_v10, %v852_v17  ;;  %s2282_s9 = scalar_lea.hbm %s2346_s5, %s1347_s22  ;;  %p1580_p10 = scmp.ne.s32.totalorder %s2284_s27, %s1579_s11 }
 0x166   : > { %v763_v14 = vmul.f32 %v2031_v12, %v739_v11  ;;  %v908_v19 = vld [vmem:[#allocation2 + $0x1a] sm:$0xff]  ;;  %v2048_v20 = vld [vmem:[%s2344_s3 + $0x5] ss:$0 sm:$0xff]  ;;  %v820_v24 = vmul.f32 %v2038_v16, %v796_v15  ;;  %v2056_v25 = vld [vmem:[%s2344_s3 + $0x6] ss:$0 sm:$0xff]  ;;  %v876_v27 = vmul.f32 %v2043_v18, %v852_v17  ;;  %v822_v38 = vmul.f32 %v2038_v16, %v965_v28  ;;  %s1690_s24 = smov [#allocation8]  }
 0x167   : > { %v723_v23 = vadd.f32 %v707_v13, %v651_v9  ;;  %v765_v26 = vmul.f32 %v2031_v12, %v908_v19  ;;  %v2063_v29 = vld [vmem:[%s2344_s3 + $0x7] ss:$0 sm:$0xff]  ;;  %v2068_v30 = vld [vmem:[%s2344_s3 + $0x8] ss:$0 sm:$0xff]  ;;  %v725_v31 = vadd.f32 %v709_v22, %v653_v21  ;;  %v932_v33 = vmul.f32 %v2048_v20, %v908_v19  ;;  %v684_v37 = vld [vmem:[#allocation2 + $0x9] sm:$0xff]  ;;  %p1581_p12 = pnand %p1580_p10, %p1831_p11  ;;  %s1583_s28 = sshll.u32 %s1690_s24, 4  ;;  %s1584_s28 = int_to_ptr.vmem [resolvable:$false] %s1583_s28 }
 0x168   : > { %v989_v34 = vmul.f32 %v2056_v25, %v965_v28  ;;  %v629_v36 = vld [vmem:[#allocation2 + $0x8] sm:$0xff]  ;;  %v1077_v39 = vld [vmem:[#allocation2 + $0x32] sm:$0xff]  ;;  %v708_v41 = vmul.f32 %v2026_v10, %v684_v37  ;;  %v878_v44 = vmul.f32 %v2043_v18, %v1021_v35  ;;  %v1045_v46 = vmul.f32 %v2063_v29, %v1021_v35  ;;  %v797_v49 = vld [vmem:[#allocation2 + $0x20] sm:$0xff]  ;;  %s1585_s30 = scalar_lea.vmem %s1584_s28, 4096  ;;  %p1586_p3 = scmp.lt.s32.totalorder %s2284_s27, %s1584_s28 }
 0x169   : > { %v779_v32 = vadd.f32 %v763_v14, %v723_v23  ;;  %v652_v40 = vmul.f32 %v2020_v7, %v629_v36  ;;  %v740_v42 = vld [vmem:[#allocation2 + $0xa] sm:$0xff]  ;;  %v781_v43 = vadd.f32 %v765_v26, %v725_v31  ;;  %v1101_v47 = vmul.f32 %v2068_v30, %v1077_v39  ;;  %v853_v52 = vld [vmem:[#allocation2 + $0x21] sm:$0xff]  ;;  %v966_v59 = vld [vmem:[#allocation2 + $0x38] sm:$0xff]  ;;  %p1582_p13 = pneg %p1581_p12  ;;  %p1587_p7 = scmp.lt.s32.totalorder %s1585_s30, %s1579_s11 }
 0x16a   : > { %v764_v48 = vmul.f32 %v2031_v12, %v740_v42  ;;  %v821_v51 = vmul.f32 %v2038_v16, %v797_v49  ;;  %v909_v53 = vld [vmem:[#allocation2 + $0x22] sm:$0xff]  ;;  %v934_v54 = vmul.f32 %v2048_v20, %v1077_v39  ;;  %v877_v57 = vmul.f32 %v2043_v18, %v853_v52  ;;  %v1022_v3 = vld [vmem:[#allocation2 + $0x39] sm:$0xff]  ;;  %v1079_v21 = vld [vmem:[#allocation2 + $0x4a] sm:$0xff] }
 0x16b   : > { %v836_v45 = vadd.f32 %v820_v24, %v779_v32  ;;  %v724_v50 = vadd.f32 %v708_v41, %v652_v40  ;;  %v933_v58 = vmul.f32 %v2048_v20, %v909_v53  ;;  %v838_v60 = vadd.f32 %v822_v38, %v781_v43  ;;  %v2084_v61 = vld [vmem:[#allocation2 + $0x48] sm:$0xff]  ;;  %v1078_v4 = vld [vmem:[#allocation2 + $0x3a] sm:$0xff]  ;;  %v2109_v40 = vld [vmem:[#allocation2 + $0x50] sm:$0xff]  ;;  %p1588_p1 = por %p1587_p7, %p1586_p3 }
 0x16c   : > { %v990_v63 = vmul.f32 %v2056_v25, %v966_v59  ;;  %v991_v0 = vmul.f32 %v2056_v25, %v2084_v61  ;;  %v654_v1 = vmul.f32 %v2020_v7, %v797_v49  ;;  %v2090_v6 = vld [vmem:[#allocation2 + $0x49] sm:$0xff]  ;;  %v710_v8 = vmul.f32 %v2026_v10, %v853_v52 }
 0x16d   : > { %v892_v56 = vadd.f32 %v876_v27, %v836_v45  ;;  %v780_v62 = vadd.f32 %v764_v48, %v724_v50  ;;  %v894_v5 = vadd.f32 %v878_v44, %v838_v60  ;;  %v766_v9 = vmul.f32 %v2031_v12, %v909_v53  ;;  %v1024_v45 = vld [vmem:[#allocation2 + $0x51] sm:$0xff]  ;;  %p1589_p2 = pnand %p1588_p1, %p1582_p13 }
 0x16e   : > { %v1046_v13 = vmul.f32 %v2063_v29, %v1022_v3  ;;  %v1102_v14 = vmul.f32 %v2068_v30, %v1078_v4  ;;  %v1047_v15 = vmul.f32 %v2063_v29, %v2090_v6  ;;  %v726_v22 = vadd.f32 %v710_v8, %v654_v1  ;;  %v1025_v8 = vld [vmem:[#allocation2 + $0x61] sm:$0xff] }
 0x16f   : > { %v948_v2 = vadd.f32 %v932_v33, %v892_v56  ;;  %v837_v11 = vadd.f32 %v821_v51, %v780_v62  ;;  %v950_v19 = vadd.f32 %v934_v54, %v894_v5  ;;  %v823_v23 = vmul.f32 %v2038_v16, %v966_v59  ;;  %v2120_v56 = vld [vmem:[#allocation2 + $0x60] sm:$0xff] }
 0x170   : > { %v1103_v26 = vmul.f32 %v2068_v30, %v1079_v21  ;;  %v879_v27 = vmul.f32 %v2043_v18, %v1022_v3  ;;  %v711_v28 = vmul.f32 %v2026_v10, %v1021_v35  ;;  %v782_v33 = vadd.f32 %v766_v9, %v726_v22  ;;  %v1081_v22 = vld [vmem:[#allocation2 + $0x62] sm:$0xff] }
 0x171   : > { %v1005_v17 = vadd.f32 %v989_v34, %v948_v2  ;;  %v893_v24 = vadd.f32 %v877_v57, %v837_v11  ;;  %v1007_v32 = vadd.f32 %v991_v0, %v950_v19  ;;  %v767_v36 = vmul.f32 %v2031_v12, %v1077_v39  ;;  %v2106_v34 = vld [vmem:[%s2345_s4] ss:$0 sm:$0xff]  ;;  %v1080_v2 = vld [vmem:[#allocation2 + $0x52] sm:$0xff] }
 0x172   : > { %v935_v38 = vmul.f32 %v2048_v20, %v1078_v4  ;;  %v727_v41 = vadd.f32 %v711_v28, %v655_v55  ;;  %v824_v42 = vmul.f32 %v2038_v16, %v2084_v61  ;;  %v839_v44 = vadd.f32 %v823_v23, %v782_v33  ;;  %v970_v33 = vld [vmem:[#allocation2 + $0x68] sm:$0xff] }
 0x173   : > { %v1061_v31 = vadd.f32 %v1045_v46, %v1005_v17  ;;  %v949_v37 = vadd.f32 %v933_v58, %v893_v24  ;;  %v1063_v43 = vadd.f32 %v1047_v15, %v1007_v32  ;;  %v992_v39 = vmul.f32 %v2056_v25, %v2109_v40 }
 0x174   : > { %v1048_v48 = vmul.f32 %v2063_v29, %v1024_v45  ;;  %v783_v49 = vadd.f32 %v767_v36, %v727_v41  ;;  %v880_v50 = vmul.f32 %v2043_v18, %v2090_v6  ;;  %v895_v53 = vadd.f32 %v879_v27, %v839_v44  ;;  %v1082_v44 = vld [vmem:[#allocation2 + $0x6a] sm:$0xff] }
 0x175   : > { %v1117_v35 = vadd.f32 %v1101_v47, %v1061_v31  ;;  %v1006_v46 = vadd.f32 %v990_v63, %v949_v37  ;;  %v1119_v52 = vadd.f32 %v1103_v26, %v1063_v43  ;;  %v936_v47 = vmul.f32 %v2048_v20, %v1079_v21 }
 0x176   : > { %v840_v55 = vadd.f32 %v824_v42, %v783_v49  ;;  %v656_v57 = vmul.f32 %v2020_v7, %v966_v59  ;;  %v712_v58 = vmul.f32 %v2026_v10, %v1022_v3  ;;  %v951_v62 = vadd.f32 %v935_v38, %v895_v53  ;;  %v1026_v38 = vld [vmem:[#allocation2 + $0x69] sm:$0xff] }
 0x177   : > { %v1140_v51 = vadd.f32 %v2106_v34, %v1117_v35  ;;  %v1062_v54 = vadd.f32 %v1046_v13, %v1006_v46  ;;  %v1142_v60 = vadd.f32 %v2106_v34, %v1119_v52  ;;  %v993_v63 = vmul.f32 %v2056_v25, %v2120_v56 }
 0x178   : > { %v768_v0 = vmul.f32 %v2031_v12, %v1078_v4  ;;  %v896_v5 = vadd.f32 %v880_v50, %v840_v55  ;;  %v728_v9 = vadd.f32 %v712_v58, %v656_v57  ;;  %v825_v59 = vmul.f32 %v2038_v16, %v2109_v40  ;;  %v1027_v55 = vld [vmem:[#allocation2 + $0x79] sm:$0xff] }
 0x179   : > { %1156 = vst.msk [vmem:[%s2007_s6] sm:$0xff] %vm561_vm1, %v1140_v51  ;;  %v1118_v1 = vadd.f32 %v1102_v14, %v1062_v54  ;;  %1158 = vst.msk [vmem:[%s2007_s6 + $0x10] sm:$0xff] %vm561_vm1, %v1142_v60  ;;  %v1008_v3 = vadd.f32 %v992_v39, %v951_v62  ;;  %v1104_v11 = vmul.f32 %v2068_v30, %v1080_v2  ;;  %v971_v54 = vld [vmem:[#allocation2 + $0x78] sm:$0xff] }
 0x17a   : > { %v1049_v13 = vmul.f32 %v2063_v29, %v1025_v8  ;;  %v952_v17 = vadd.f32 %v936_v47, %v896_v5  ;;  %v784_v4 = vadd.f32 %v768_v0, %v728_v9  ;;  %v881_v14 = vmul.f32 %v2043_v18, %v1024_v45  ;;  %v1083_v0 = vld [vmem:[#allocation2 + $0x7a] sm:$0xff] }
 0x17b   : > { %v1141_v15 = vadd.f32 %v2106_v34, %v1118_v1  ;;  %v1064_v19 = vadd.f32 %v1048_v48, %v1008_v3  ;;  %v657_v23 = vmul.f32 %v2020_v7, %v2084_v61  ;;  %v713_v24 = vmul.f32 %v2026_v10, %v2090_v6  ;;  %v972_v3 = vld [vmem:[#allocation2 + $0x80] sm:$0xff] }
 0x17c   : > { %v769_v26 = vmul.f32 %v2031_v12, %v1079_v21  ;;  %v1009_v27 = vadd.f32 %v993_v63, %v952_v17  ;;  %v1105_v28 = vmul.f32 %v2068_v30, %v1081_v22  ;;  %v841_v31 = vadd.f32 %v825_v59, %v784_v4 }
 0x17d   : > { %1157 = vst.msk [vmem:[%s2007_s6 + $0x8] sm:$0xff] %vm561_vm1, %v1141_v15  ;;  %v937_v32 = vmul.f32 %v2048_v20, %v1080_v2  ;;  %v1120_v36 = vadd.f32 %v1104_v11, %v1064_v19  ;;  %v994_v37 = vmul.f32 %v2056_v25, %v970_v33  ;;  %v729_v61 = vadd.f32 %v713_v24, %v657_v23  ;;  %v1028_v19 = vld [vmem:[#allocation2 + $0x81] sm:$0xff] }
 0x17e   : > { %v826_v6 = vmul.f32 %v2038_v16, %v2120_v56  ;;  %v1065_v41 = vadd.f32 %v1049_v13, %v1009_v27  ;;  %v897_v21 = vadd.f32 %v881_v14, %v841_v31  ;;  %v1050_v42 = vmul.f32 %v2063_v29, %v1026_v38 }
 0x17f   : > { %v882_v35 = vmul.f32 %v2043_v18, %v1025_v8  ;;  %v1143_v43 = vadd.f32 %v2106_v34, %v1120_v36  ;;  %v785_v39 = vadd.f32 %v769_v26, %v729_v61  ;;  %v658_v46 = vmul.f32 %v2020_v7, %v2109_v40 }
 0x180   : > { %v714_v48 = vmul.f32 %v2026_v10, %v1024_v45  ;;  %v1121_v49 = vadd.f32 %v1105_v28, %v1065_v41  ;;  %v953_v50 = vadd.f32 %v937_v32, %v897_v21  ;;  %v1106_v51 = vmul.f32 %v2068_v30, %v1082_v44  ;;  %v1084_v32 = vld [vmem:[#allocation2 + $0x82] sm:$0xff] }
 0x181   : > { %v770_v52 = vmul.f32 %v2031_v12, %v1080_v2  ;;  %1159 = vst.msk [vmem:[%s2007_s6 + $0x18] sm:$0xff] %vm561_vm1, %v1143_v43  ;;  %v842_v53 = vadd.f32 %v826_v6, %v785_v39  ;;  %v938_v47 = vmul.f32 %v2048_v20, %v1081_v22  ;;  %v827_v58 = vmul.f32 %v2038_v16, %v970_v33  ;;  %v1029_v39 = vld [vmem:[#allocation2 + $0x91] sm:$0xff] }
 0x182   : > { %v730_v57 = vadd.f32 %v714_v48, %v658_v46  ;;  %v1144_v40 = vadd.f32 %v2106_v34, %v1121_v49  ;;  %v1010_v45 = vadd.f32 %v994_v37, %v953_v50  ;;  %v995_v60 = vmul.f32 %v2056_v25, %v971_v54 }
 0x183   : > { %v1051_v62 = vmul.f32 %v2063_v29, %v1027_v55  ;;  %v898_v63 = vadd.f32 %v882_v35, %v842_v53  ;;  %v883_v2 = vmul.f32 %v2043_v18, %v1026_v38  ;;  %v659_v5 = vmul.f32 %v2020_v7, %v2120_v56  ;;  %v973_v35 = vld [vmem:[#allocation2 + $0x90] sm:$0xff] }
 0x184   : > { %v786_v1 = vadd.f32 %v770_v52, %v730_v57  ;;  %1160 = vst.msk [vmem:[%s2007_s6 + $0x20] sm:$0xff] %vm561_vm1, %v1144_v40  ;;  %v1066_v9 = vadd.f32 %v1050_v42, %v1010_v45  ;;  %v1107_v59 = vmul.f32 %v2068_v30, %v1083_v0  ;;  %v715_v11 = vmul.f32 %v2026_v10, %v1025_v8 }
 0x185   : > { %v771_v13 = vmul.f32 %v2031_v12, %v1081_v22  ;;  %v954_v15 = vadd.f32 %v938_v47, %v898_v63  ;;  %v939_v4 = vmul.f32 %v2048_v20, %v1082_v44  ;;  %v996_v14 = vmul.f32 %v2056_v25, %v972_v3 }
 0x186   : > { %v843_v17 = vadd.f32 %v827_v58, %v786_v1  ;;  %v1122_v23 = vadd.f32 %v1106_v51, %v1066_v9  ;;  %v1052_v56 = vmul.f32 %v2063_v29, %v1028_v19  ;;  %v731_v24 = vadd.f32 %v715_v11, %v659_v5  ;;  %v974_v1 = vld [vmem:[#allocation2 + $0x98] sm:$0xff] }
 0x187   : > { %v828_v26 = vmul.f32 %v2038_v16, %v971_v54  ;;  %v1011_v27 = vadd.f32 %v995_v60, %v954_v15  ;;  %v884_v8 = vmul.f32 %v2043_v18, %v1027_v55  ;;  %v660_v22 = vmul.f32 %v2020_v7, %v970_v33 }
 0x188   : > { %v899_v28 = vadd.f32 %v883_v2, %v843_v17  ;;  %v1145_v31 = vadd.f32 %v2106_v34, %v1122_v23  ;;  %v787_v36 = vadd.f32 %v771_v13, %v731_v24  ;;  %v716_v37 = vmul.f32 %v2026_v10, %v1026_v38  ;;  %v1030_v2 = vld [vmem:[#allocation2 + $0x99] sm:$0xff] }
 0x189   : > { %v772_v61 = vmul.f32 %v2031_v12, %v1082_v44  ;;  %v1067_v6 = vadd.f32 %v1051_v62, %v1011_v27  ;;  %v1108_v21 = vmul.f32 %v2068_v30, %v1084_v32  ;;  %v940_v42 = vmul.f32 %v2048_v20, %v1083_v0  ;;  %v1085_v62 = vld [vmem:[#allocation2 + $0x92] sm:$0xff]  ;;  %v1086_v27 = vld [vmem:[#allocation2 + $0x9a] sm:$0xff] }
 0x18a   : > { %v955_v41 = vadd.f32 %v939_v4, %v899_v28  ;;  %1161 = vst.msk [vmem:[%s2007_s6 + $0x28] sm:$0xff] %vm561_vm1, %v1145_v31  ;;  %v844_v43 = vadd.f32 %v828_v26, %v787_v36  ;;  %v997_v33 = vmul.f32 %v2056_v25, %v973_v35  ;;  %v732_v46 = vadd.f32 %v716_v37, %v660_v22  ;;  %v975_v22 = vld [vmem:[#allocation2 + $0xa8] sm:$0xff] }
 0x18b   : > { %v829_v48 = vmul.f32 %v2038_v16, %v972_v3  ;;  %v1123_v49 = vadd.f32 %v1107_v59, %v1067_v6  ;;  %v1053_v44 = vmul.f32 %v2063_v29, %v1029_v39  ;;  %v885_v50 = vmul.f32 %v2043_v18, %v1028_v19  ;;  %v1031_v37 = vld [vmem:[#allocation2 + $0xa9] sm:$0xff] }
 0x18c   : > { %v1012_v38 = vadd.f32 %v996_v14, %v955_v41  ;;  %v900_v51 = vadd.f32 %v884_v8, %v844_v43  ;;  %v788_v52 = vadd.f32 %v772_v61, %v732_v46  ;;  %v661_v53 = vmul.f32 %v2020_v7, %v971_v54 }
 0x18d   : > { %v717_v47 = vmul.f32 %v2026_v10, %v1027_v55  ;;  %v1146_v57 = vadd.f32 %v2106_v34, %v1123_v49  ;;  %v941_v40 = vmul.f32 %v2048_v20, %v1084_v32  ;;  %v773_v45 = vmul.f32 %v2031_v12, %v1083_v0 }
 0x18e   : > { %v1068_v58 = vadd.f32 %v1052_v56, %v1012_v38  ;;  %v956_v60 = vadd.f32 %v940_v42, %v900_v51  ;;  %v845_v63 = vadd.f32 %v829_v48, %v788_v52  ;;  %v830_v9 = vmul.f32 %v2038_v16, %v973_v35  ;;  %v976_v52 = vld [vmem:[#allocation2 + $0xb0] sm:$0xff] }
 0x18f   : > { %v733_v5 = vadd.f32 %v717_v47, %v661_v53  ;;  %1162 = vst.msk [vmem:[%s2007_s6 + $0x30] sm:$0xff] %vm561_vm1, %v1146_v57  ;;  %v1109_v55 = vmul.f32 %v2068_v30, %v1085_v62  ;;  %v998_v59 = vmul.f32 %v2056_v25, %v974_v1  ;;  %v1054_v11 = vmul.f32 %v2063_v29, %v1030_v2 }
 0x190   : > { %v1124_v54 = vadd.f32 %v1108_v21, %v1068_v58  ;;  %v1013_v13 = vadd.f32 %v997_v33, %v956_v60  ;;  %v901_v0 = vadd.f32 %v885_v50, %v845_v63  ;;  %v886_v17 = vmul.f32 %v2043_v18, %v1029_v39 }
 0x191   : > { %v789_v15 = vadd.f32 %v773_v45, %v733_v5  ;;  %v662_v14 = vmul.f32 %v2020_v7, %v972_v3  ;;  %v718_v23 = vmul.f32 %v2026_v10, %v1028_v19  ;;  %v774_v56 = vmul.f32 %v2031_v12, %v1084_v32 }
 0x192   : > { %v1147_v4 = vadd.f32 %v2106_v34, %v1124_v54  ;;  %v1069_v24 = vadd.f32 %v1053_v44, %v1013_v13  ;;  %v957_v26 = vadd.f32 %v941_v40, %v901_v0  ;;  %v942_v8 = vmul.f32 %v2048_v20, %v1085_v62  ;;  %v1087_v44 = vld [vmem:[#allocation2 + $0xaa] sm:$0xff] }
 0x193   : > { %v846_v28 = vadd.f32 %v830_v9, %v789_v15  ;;  %v1110_v31 = vmul.f32 %v2068_v30, %v1086_v27  ;;  %v999_v36 = vmul.f32 %v2056_v25, %v975_v22  ;;  %v734_v61 = vadd.f32 %v718_v23, %v662_v14  ;;  %v1032_v40 = vld [vmem:[#allocation2 + $0xb1] sm:$0xff]  ;;  %v977_v14 = vld [vmem:[#allocation2 + $0xc0] sm:$0xff] }
 0x194   : > { %1163 = vst.msk [vmem:[%s2007_s6 + $0x38] sm:$0xff] %vm561_vm1, %v1147_v4  ;;  %v831_v3 = vmul.f32 %v2038_v16, %v974_v1  ;;  %v1125_v19 = vadd.f32 %v1109_v55, %v1069_v24  ;;  %v1014_v6 = vadd.f32 %v998_v59, %v957_v26  ;;  %v1055_v41 = vmul.f32 %v2063_v29, %v1031_v37  ;;  %v1033_v23 = vld [vmem:[#allocation2 + $0xc1] sm:$0xff] }
 0x195   : > { %v902_v32 = vadd.f32 %v886_v17, %v846_v28  ;;  %v790_v21 = vadd.f32 %v774_v56, %v734_v61  ;;  %v887_v42 = vmul.f32 %v2043_v18, %v1030_v2  ;;  %v663_v43 = vmul.f32 %v2020_v7, %v973_v35 }
 0x196   : > { %v719_v33 = vmul.f32 %v2026_v10, %v1029_v39  ;;  %v1148_v46 = vadd.f32 %v2106_v34, %v1125_v19  ;;  %v1070_v48 = vadd.f32 %v1054_v11, %v1014_v6  ;;  %v775_v38 = vmul.f32 %v2031_v12, %v1085_v62  ;;  %v1088_v11 = vld [vmem:[#allocation2 + $0xb2] sm:$0xff]  ;;  %v1089_v19 = vld [vmem:[#allocation2 + $0xc2] sm:$0xff] }
 0x197   : > { %v958_v49 = vadd.f32 %v942_v8, %v902_v32  ;;  %v847_v50 = vadd.f32 %v831_v3, %v790_v21  ;;  %v943_v51 = vmul.f32 %v2048_v20, %v1086_v27  ;;  %v832_v47 = vmul.f32 %v2038_v16, %v975_v22 }
 0x198   : > { %v735_v53 = vadd.f32 %v719_v33, %v663_v43  ;;  %1164 = vst.msk [vmem:[%s2007_s6 + $0x40] sm:$0xff] %vm561_vm1, %v1148_v46  ;;  %v1126_v57 = vadd.f32 %v1110_v31, %v1070_v48  ;;  %v1111_v39 = vmul.f32 %v2068_v30, %v1087_v44  ;;  %v1000_v58 = vmul.f32 %v2056_v25, %v976_v52  ;;  %v978_v46 = vld [vmem:[#allocation2 + $0xc8] sm:$0xff] }
 0x199   : > { %v1015_v35 = vadd.f32 %v999_v36, %v958_v49  ;;  %v903_v45 = vadd.f32 %v887_v42, %v847_v50  ;;  %v1056_v60 = vmul.f32 %v2063_v29, %v1032_v40  ;;  %v888_v63 = vmul.f32 %v2043_v18, %v1031_v37 }
 0x19a   : > { %v791_v62 = vadd.f32 %v775_v38, %v735_v53  ;;  %v1149_v5 = vadd.f32 %v2106_v34, %v1126_v57  ;;  %v664_v54 = vmul.f32 %v2020_v7, %v974_v1  ;;  %v720_v55 = vmul.f32 %v2026_v10, %v1030_v2  ;;  %v1034_v53 = vld [vmem:[#allocation2 + $0xc9] sm:$0xff]  ;;  %v979_v57 = vld [vmem:[#allocation2 + $0xd8] sm:$0xff] }
 0x19b   : > { %v1071_v9 = vadd.f32 %v1055_v41, %v1015_v35  ;;  %v959_v59 = vadd.f32 %v943_v51, %v903_v45  ;;  %v944_v0 = vmul.f32 %v2048_v20, %v1087_v44  ;;  %v776_v15 = vmul.f32 %v2031_v12, %v1086_v27 }
 0x19c   : > { %v848_v13 = vadd.f32 %v832_v47, %v791_v62  ;;  %1165 = vst.msk [vmem:[%s2007_s6 + $0x48] sm:$0xff] %vm561_vm1, %v1149_v5  ;;  %v1112_v4 = vmul.f32 %v2068_v30, %v1088_v11  ;;  %v736_v56 = vadd.f32 %v720_v55, %v664_v54  ;;  %v833_v1 = vmul.f32 %v2038_v16, %v976_v52 }
 0x19d   : > { %v1127_v17 = vadd.f32 %v1111_v39, %v1071_v9  ;;  %v1016_v24 = vadd.f32 %v1000_v58, %v959_v59  ;;  %v1001_v26 = vmul.f32 %v2056_v25, %v977_v14  ;;  %v1057_v28 = vmul.f32 %v2063_v29, %v1033_v23 }
 0x19e   : > { %v904_v2 = vadd.f32 %v888_v63, %v848_v13  ;;  %v792_v27 = vadd.f32 %v776_v15, %v736_v56  ;;  %v889_v31 = vmul.f32 %v2043_v18, %v1032_v40  ;;  %v665_v36 = vmul.f32 %v2020_v7, %v975_v22  ;;  %v980_v15 = vld [vmem:[#allocation2 + $0xe0] sm:$0xff] }
 0x19f   : > { %v1150_v8 = vadd.f32 %v2106_v34, %v1127_v17  ;;  %v1072_v61 = vadd.f32 %v1056_v60, %v1016_v24  ;;  %v721_v6 = vmul.f32 %v2026_v10, %v1031_v37  ;;  %v777_v32 = vmul.f32 %v2031_v12, %v1087_v44  ;;  %v1036_v56 = vld [vmem:[#allocation2 + $0xe1] sm:$0xff] }
 0x1a0   : > { %v960_v3 = vadd.f32 %v944_v0, %v904_v2  ;;  %v1113_v41 = vmul.f32 %v2068_v30, %v1089_v19  ;;  %v849_v21 = vadd.f32 %v833_v1, %v792_v27  ;;  %v945_v42 = vmul.f32 %v2048_v20, %v1088_v11  ;;  %v1091_v0 = vld [vmem:[#allocation2 + $0xda] sm:$0xff] }
 0x1a1   : > { %1166 = vst.msk [vmem:[%s2007_s6 + $0x50] sm:$0xff] %vm561_vm1, %v1150_v8  ;;  %v1128_v43 = vadd.f32 %v1112_v4, %v1072_v61  ;;  %v737_v48 = vadd.f32 %v721_v6, %v665_v36  ;;  %v834_v22 = vmul.f32 %v2038_v16, %v977_v14  ;;  %v1002_v38 = vmul.f32 %v2056_v25, %v978_v46 }
 0x1a2   : > { %v1017_v33 = vadd.f32 %v1001_v26, %v960_v3  ;;  %v905_v49 = vadd.f32 %v889_v31, %v849_v21  ;;  %v890_v37 = vmul.f32 %v2043_v18, %v1033_v23  ;;  %v666_v44 = vmul.f32 %v2020_v7, %v976_v52  ;;  %v1090_v7 = vld [vmem:[#allocation2 + $0xca] sm:$0xff] }
 0x1a3   : > { %v1151_v50 = vadd.f32 %v2106_v34, %v1128_v43  ;;  %v793_v47 = vadd.f32 %v777_v32, %v737_v48  ;;  %v722_v35 = vmul.f32 %v2026_v10, %v1032_v40  ;;  %v1058_v58 = vmul.f32 %v2063_v29, %v1034_v53  ;;  %v1035_v40 = vld [vmem:[#allocation2 + $0xd9] sm:$0xff] }
 0x1a4   : > { %v1073_v51 = vadd.f32 %v1057_v28, %v1017_v33  ;;  %v961_v39 = vadd.f32 %v945_v42, %v905_v49  ;;  %v946_v45 = vmul.f32 %v2048_v20, %v1089_v19  ;;  %v778_v60 = vmul.f32 %v2031_v12, %v1088_v11  ;;  %v1092_v28 = vld [vmem:[#allocation2 + $0xe2] sm:$0xff] }
 0x1a5   : > { %1167 = vst.msk [vmem:[%s2007_s6 + $0x58] sm:$0xff] %vm561_vm1, %v1151_v50  ;;  %v850_v52 = vadd.f32 %v834_v22, %v793_v47  ;;  %v738_v63 = vadd.f32 %v722_v35, %v666_v44  ;;  %v835_v5 = vmul.f32 %v2038_v16, %v978_v46  ;;  %v1114_v54 = vmul.f32 %v2068_v30, %v1090_v7 }
 0x1a6   : > { %v1129_v62 = vadd.f32 %v1113_v41, %v1073_v51  ;;  %v1018_v9 = vadd.f32 %v1002_v38, %v961_v39  ;;  %v1003_v10 = vmul.f32 %v2056_v25, %v979_v57  ;;  %v891_v12 = vmul.f32 %v2043_v18, %v1034_v53 }
 0x1a7   : > { %v906_v59 = vadd.f32 %v890_v37, %v850_v52  ;;  %v794_v13 = vadd.f32 %v778_v60, %v738_v63  ;;  %v1059_v16 = vmul.f32 %v2063_v29, %v1035_v40  ;;  %v947_v14 = vmul.f32 %v2048_v20, %v1090_v7 }
 0x1a8   : > { %v1152_v55 = vadd.f32 %v2106_v34, %v1129_v62  ;;  %v1074_v11 = vadd.f32 %v1058_v58, %v1018_v9  ;;  %v1115_v24 = vmul.f32 %v2068_v30, %v1091_v0  ;;  %v1004_v18 = vmul.f32 %v2056_v25, %v980_v15 }
 0x1a9   : > { %v962_v17 = vadd.f32 %v946_v45, %v906_v59  ;;  %v851_v4 = vadd.f32 %v835_v5, %v794_v13  ;;  %v1060_v31 = vmul.f32 %v2063_v29, %v1036_v56  ;;  %v1116_v61 = vmul.f32 %v2068_v30, %v1092_v28 }
 0x1aa   : > { %1168 = vst.msk [vmem:[%s2007_s6 + $0x60] sm:$0xff] %vm561_vm1, %v1152_v55  ;;  %v1130_v23 = vadd.f32 %v1114_v54, %v1074_v11 }
 0x1ab   : > { %v1019_v1 = vadd.f32 %v1003_v10, %v962_v17  ;;  %v907_v2 = vadd.f32 %v891_v12, %v851_v4 }
 0x1ac   : > { %v1153_v26 = vadd.f32 %v2106_v34, %v1130_v23 }
 0x1ad   : > { %v1075_v8 = vadd.f32 %v1059_v16, %v1019_v1  ;;  %v963_v27 = vadd.f32 %v947_v14, %v907_v2 }
 0x1ae   : > { %1169 = vst.msk [vmem:[%s2007_s6 + $0x68] sm:$0xff] %vm561_vm1, %v1153_v26 }
 0x1af   : > { %v1131_v20 = vadd.f32 %v1115_v24, %v1075_v8  ;;  %v1020_v36 = vadd.f32 %v1004_v18, %v963_v27 }
 0x1b1   : > { %v1154_v25 = vadd.f32 %v2106_v34, %v1131_v20  ;;  %v1076_v3 = vadd.f32 %v1060_v31, %v1020_v36 }
 0x1b3   : > { %1170 = vst.msk [vmem:[%s2007_s6 + $0x70] sm:$0xff] %vm561_vm1, %v1154_v25  ;;  %v1132_v19 = vadd.f32 %v1116_v61, %v1076_v3 }
 0x1b5   : > { %v1155_v29 = vadd.f32 %v2106_v34, %v1132_v19 }
 0x1b7   : > { %1171 = vst.msk [vmem:[%s2007_s6 + $0x78] sm:$0xff] %vm561_vm1, %v1155_v29 }
 0x1b8   : > { %1592 = shalt.err (!%p1589_p2)
}
 0x1b9   : > { %s1593_s6 = scalar_lea.hbm %s2282_s9, 2048  ;;  %s1597_s1 = scalar_lea.hbm %s2346_s5, 8192 }
 0x1ba   : > { %p1594_p4 = scmp.ne.s32.totalorder %s2282_s9, %s1593_s6  ;;  %p1598_p0 = scmp.lt.u32.totalorder %s2282_s9, %s2346_s5 }
 0x1bb   : > { %p1599_p6 = scmp.lt.u32.totalorder %s1597_s1, %s1593_s6  ;;  %p1601_p10 = scmp.lt.u32.totalorder %s1593_s6, %s2282_s9 }
 0x1bc   : > { %p1595_p5 = pnand %p1594_p4, %p1831_p11 }
 0x1bd   : > { %p1600_p8 = por %p1599_p6, %p1598_p0 }
 0x1be   : > { %p1596_p9 = pneg %p1595_p5 }
 0x1bf   : > { %p1602_p12 = por %p1601_p10, %p1600_p8 }
 0x1c1   : > { %p1603_p13 = pnand %p1602_p12, %p1596_p9 }
 0x1c3   : > { %1606 = shalt.err (!%p1603_p13)
}
 0x1c4   : > { %s1691_s15 = smov 128   ;;  %s1692_s29 = smov 8  }
 0x1c5   : > { %1431 = dma.vmem_to_hbm [thread:$0]  (%p1831_p11), %s2284_s27, 2048, %s2282_s9, %s1173_s21, %s1691_s15, %s1691_s15, %s1692_s29  }
 0x1c6 PF: > { %s2378_s22 = sld [smem:[#allocation12_spill]]  ;;  %s2379_s23 = sld [smem:[#allocation15_spill]] }
 0x1c7   : > { %p1448_p3 = scmp.ge.s32.totalorder %s1681_s25, 2 }
 0x1cc   : > { %s1203_s16 = sand.u32 1, %s2378_s22   ;;  %p2380_p7 = scmp.ne.s32.totalorder %s2379_s23, 0 }
 0x1cd   : > { %s1204_s11 = scalar_lea.sflag [#allocation5], %s1203_s16 }
 0x1ce   : > { %p1442_p1 = pnand %p1448_p3, %p2380_p7 }
 0x1d0   : > { %1648 = dma.done.wait (!%p1442_p1), %s1204_s11, 2048  }
 0x1d1   : > { %1650 = vsyncadd (!%p1442_p1), %s1204_s11, 4294965248  ;;  %s22_s25 = sadd.s32 1, %s1681_s25   ;;  %s2381_s24 = smov %s1851_s18 }
 0x1d2   : > { %p19_p2 = scmp.ge.s32.totalorder %s22_s25, 6   ;;  %s2382_s21 = sld [smem:[#allocation13_spill]] }
 0x1d3   : > { %s2383_s22 = sld [smem:[#allocation14_spill]]  ;;  %s2384_s18 = smov %s1657_s19 }
 0x1d4   : > { %s2385_s19 = smov %s1661_s20  ;;  %s2386_s20 = smov %s2381_s24 }
 0x1d5   : > { %s2387_s23 = smov %s2390_s13  ;;  %s2388_s24 = smov %s2394_s14 }
 0x1d6   :  { %21 = sbr.rel (!%p19_p2) target bundleno = 10 (0xa), region = 108 }
 0x1dd   :  { %1209 = vsyncpa [#allocation4], 1 }
 0x1de   :  { %1211 = vsyncpa [#allocation4 + $0x1], 1 }
 0x1df   :  { %1212 = vsyncpa [#allocation7], 1 }
 0x1e0   :  { %1213 = vsyncpa [#allocation5], 1 }
 0x1e1   :  { %1215 = vsyncpa [#allocation5 + $0x1], 1 }

</bundles_post_ra>
